<compile_context>
chip_gen: v7x
topology: tpu7x:2x2x1
jax: 0.10.0
libtpu: 0.0.40
codegen_flags: <defaults>
</compile_context>

<pallas_src>
import math
import functools

import jax
import jax.numpy as jnp
from jax import lax
from jax.experimental import pallas as pl
from jax.experimental.pallas import tpu as pltpu


_MXU_DTYPE = jnp.bfloat16      # matmul-input dtype (f32 accumulation everywhere)
_WEIGHT_DTYPE = jnp.bfloat16   # storage dtype of the large matmul weights


# ----------------------------- fused decoder kernel --------------------------

def _layer_norm(x, g, b, eps=1e-6):
    mu = jnp.mean(x, axis=-1, keepdims=True)
    var = jnp.mean((x - mu) ** 2, axis=-1, keepdims=True)
    return (x - mu) * lax.rsqrt(var + eps) * g + b


def _fused_decoder_kernel(x_ref, temb_ref, bias_ref, pos_ref,
                          embw_ref, embb_ref,
                          wq_ref, wk_ref, wv_ref, wo_ref,
                          w1_ref, w2_ref, vec_ref,
                          outw_ref, outb_ref,
                          o_ref, feat_ref,
                          *, n_head, d_k, d_v, d_inner):
    """Grid = (batch_chunk, layer).  Activations live in feat_ref (VMEM)."""
    l = pl.program_id(1)
    Bc, S, D = feat_ref.shape
    T = S - 1
    N = Bc * S

    # ---------------- prologue (layer 0): embedding + token prepend + pos ----
    @pl.when(l == 0)
    def _():
        x = x_ref[...]                                       # (Bc, T, d_in) f32
        d_in = x.shape[-1]
        emb = jnp.dot(x.reshape(Bc * T, d_in).astype(_MXU_DTYPE), embw_ref[...],
                      preferred_element_type=jnp.float32) + embb_ref[...]
        pos = pos_ref[...]                                   # (S, D) f32
        # write directly into the resident activation slab (no concat copy)
        feat_ref[:, 0:1, :] = temb_ref[...] + pos[0:1, :][None]
        feat_ref[:, 1:, :] = emb.reshape(Bc, T, D) + pos[1:, :][None]

    # ---------------- one post-LN transformer layer --------------------------
    xf = feat_ref[...]                                       # (Bc, S, D) f32
    x2d = xf.reshape(N, D)
    x_bf = x2d.astype(_MXU_DTYPE)                            # hoisted cast

    # packed per-layer small vectors: rows = ln1_g, ln1_b, b1, b2, ln2_g, ln2_b
    vec = vec_ref[...]                                       # (8, Vmax) f32
    ln1_g = vec[0:1, :D]
    ln1_b = vec[1:2, :D]
    b1 = vec[2:3, :d_inner]
    b2 = vec[3:4, :D]
    ln2_g = vec[4:5, :D]
    ln2_b = vec[5:6, :D]

    bias = bias_ref[...]                                     # (Bc, 1, S) f32
    inv_temp = 1.0 / math.sqrt(d_k)

    # Multi-head attention; heads come from head-split weights (leading-dim
    # index, no lane slices), output projection accumulated over heads
    # (no lane-axis concat).
    attn = jnp.zeros((N, D), jnp.float32)
    for h in range(n_head):                                  # static unroll
        qh = jnp.dot(x_bf, wq_ref[h], preferred_element_type=jnp.float32)
        kh = jnp.dot(x_bf, wk_ref[h], preferred_element_type=jnp.float32)
        vh = jnp.dot(x_bf, wv_ref[h], preferred_element_type=jnp.float32)
        q3 = qh.reshape(Bc, S, d_k).astype(_MXU_DTYPE)
        k3 = kh.reshape(Bc, S, d_k).astype(_MXU_DTYPE)
        v3 = vh.reshape(Bc, S, d_v).astype(_MXU_DTYPE)
        s = jnp.einsum('bqd,bkd->bqk', q3, k3,
                       preferred_element_type=jnp.float32)   # (Bc, S, S) f32
        s = s * inv_temp + bias
        s = s - jnp.max(s, axis=-1, keepdims=True)
        p = jnp.exp(s)
        p = p * pl.reciprocal(jnp.sum(p, axis=-1, keepdims=True), approx=True)
        ctx = jnp.einsum('bqk,bkd->bqd', p.astype(_MXU_DTYPE), v3,
                         preferred_element_type=jnp.float32)  # (Bc, S, dv)
        attn = attn + jnp.dot(ctx.reshape(N, d_v).astype(_MXU_DTYPE), wo_ref[h],
                              preferred_element_type=jnp.float32)

    x1 = _layer_norm(attn + x2d, ln1_g, ln1_b)               # post-LN, f32
    x1_bf = x1.astype(_MXU_DTYPE)                            # hoisted cast
    h1 = jnp.maximum(jnp.dot(x1_bf, w1_ref[...],
                             preferred_element_type=jnp.float32) + b1, 0.0)
    h2 = jnp.dot(h1.astype(_MXU_DTYPE), w2_ref[...],
                 preferred_element_type=jnp.float32) + b2
    x2 = _layer_norm(h2 + x1, ln2_g, ln2_b)

    feat_ref[...] = x2.reshape(Bc, S, D)

    # ---------------- epilogue (last layer): lane-dense linear_out -----------
    # Written only at l == last; valid while the layer axis is "arbitrary".
    @pl.when(l == pl.num_programs(1) - 1)
    def _():
        out = jnp.dot(x2.astype(_MXU_DTYPE), outw_ref[...],
                      preferred_element_type=jnp.float32) + outb_ref[...]
        o_ref[...] = out.reshape(Bc, S, -1)                  # all S rows, dense


def fused_decoder_call(x_cat, t_emb3, neg_bias, pos_tab, params, cfg):
    """One pallas_call: embedding + all transformer layers + linear_out."""
    B, T, d_in = x_cat.shape
    S = T + 1
    D = cfg["d_model"]
    H, dk, dv = cfg["n_head"], cfg["d_k"], cfg["d_v"]
    lyr = params["layers"]
    L = lyr["wq"].shape[0]
    d_inner = lyr["w1"].shape[-1]
    d_pad = params["out_w_pad"].shape[-1]

    # batch chunking: "parallel" axis so v7x's two TensorCores both work
    Bc = B // 2 if (B % 2 == 0 and B >= 2) else B
    nb = B // Bc

    kernel = functools.partial(_fused_decoder_kernel,
                               n_head=H, d_k=dk, d_v=dv, d_inner=d_inner)

    def const_spec(a):
        n = a.ndim
        return pl.BlockSpec(a.shape, lambda b, l, n=n: (0,) * n)

    def batch_spec(a):
        n = a.ndim
        return pl.BlockSpec((Bc,) + a.shape[1:],
                            lambda b, l, n=n: (b,) + (0,) * (n - 1))

    def layer_spec(a):
        n = a.ndim
        return pl.BlockSpec((None,) + a.shape[1:],
                            lambda b, l, n=n: (l,) + (0,) * (n - 1))

    out_full = pl.pallas_call(
        kernel,
        out_shape=jax.ShapeDtypeStruct((B, S, d_pad), jnp.float32),
        grid=(nb, L),
        in_specs=[
            batch_spec(x_cat),                 # concatenated src/condition
            batch_spec(t_emb3),                # time-embedding token (B,1,D)
            batch_spec(neg_bias),              # precomputed additive mask bias
            const_spec(pos_tab),               # positional table (S,D)
            const_spec(params["emb_w"]),       # embedding weight (bf16)
            const_spec(params["emb_b"]),       # embedding bias (f32)
            layer_spec(lyr["wq"]),             # (L,H,D,dk) bf16
            layer_spec(lyr["wk"]),             # (L,H,D,dk) bf16
            layer_spec(lyr["wv"]),             # (L,H,D,dv) bf16
            layer_spec(lyr["wo"]),             # (L,H,dv,D) bf16
            layer_spec(lyr["w1"]),             # (L,D,d_inner) bf16
            layer_spec(lyr["w2"]),             # (L,d_inner,D) bf16
            layer_spec(lyr["vecs"]),           # (L,8,max(D,d_inner)) f32 packed
            const_spec(params["out_w_pad"]),   # (D,d_pad) bf16, lane-dense
            const_spec(params["out_b_pad"]),   # (1,d_pad) f32
        ],
        # constant block index across the layer axis -> written once (last l)
        out_specs=pl.BlockSpec((Bc, S, d_pad), lambda b, l: (b, 0, 0)),
        scratch_shapes=[pltpu.VMEM((Bc, S, D), jnp.float32)],   # resident acts
        compiler_params=pltpu.CompilerParams(
            dimension_semantics=("parallel", "arbitrary"),
            vmem_limit_bytes=48 * 1024 * 1024),
    )(x_cat, t_emb3, neg_bias, pos_tab,
      params["emb_w"], params["emb_b"],
      lyr["wq"], lyr["wk"], lyr["wv"], lyr["wo"],
      lyr["w1"], lyr["w2"], lyr["vecs"],
      params["out_w_pad"], params["out_b_pad"])
    return out_full


# ----------------------------- plain-JAX glue ---------------------------------

def sinusoidal_pos_emb(t, dim):
    """SinusoidalPosEmb.forward: t:(B,) -> (B, dim)."""
    half = dim // 2
    emb = math.log(10000.0) / (half - 1)
    emb = jnp.exp(jnp.arange(half, dtype=jnp.float32) * -emb)
    emb = t[:, None] * emb[None, :]
    return jnp.concatenate([jnp.sin(emb), jnp.cos(emb)], axis=-1)


def sinusoid_table_from_positions(pos, d_model):
    """Standard transformer sinusoid table evaluated at integer positions."""
    pos = pos.astype(jnp.float32)
    i = jnp.arange(d_model)
    denom = jnp.power(10000.0, (2.0 * (i // 2)).astype(jnp.float32) / d_model)
    angles = pos[:, None] / denom[None, :]
    return jnp.where(i % 2 == 0, jnp.sin(angles), jnp.cos(angles)).astype(jnp.float32)


def init_params(key, d_input_feats, d_feats, d_model, n_dec_layers,
                n_head, d_k, d_v, d_inner, fourier_dim=64, time_dim=256):
    """Builds kernel-ready parameters (bf16 big weights, head-split, packed)."""
    def nrm(k, shape, scale=0.02):
        return scale * jax.random.normal(k, shape, jnp.float32)

    keys = jax.random.split(key, 6)
    d_pad = ((d_feats + 127) // 128) * 128          # lane-dense output width
    out_w = nrm(keys[3], (d_model, d_feats))
    out_b = jnp.zeros((d_feats,), jnp.float32)

    p = {
        "time_w1": nrm(keys[0], (fourier_dim, time_dim)),
        "time_b1": jnp.zeros((time_dim,), jnp.float32),
        "time_w2": nrm(keys[1], (time_dim, d_model)),
        "time_b2": jnp.zeros((d_model,), jnp.float32),
        "emb_w": nrm(keys[2], (d_input_feats, d_model)).astype(_WEIGHT_DTYPE),
        "emb_b": jnp.zeros((1, d_model), jnp.float32),
        "out_w_pad": jnp.pad(out_w, ((0, 0), (0, d_pad - d_feats))
                             ).astype(_WEIGHT_DTYPE),
        "out_b_pad": jnp.pad(out_b, (0, d_pad - d_feats)).reshape(1, d_pad),
    }

    vdim = max(d_model, d_inner)

    def head_split(w, dh):               # (D, H*dh) -> (H, D, dh)
        return jnp.moveaxis(w.reshape(d_model, n_head, dh), 1, 0)

    def row(v):                          # (n,) -> (1, vdim) zero-padded
        v = v.reshape(1, -1)
        return jnp.pad(v, ((0, 0), (0, vdim - v.shape[-1])))

    def layer_params(k):
        k1, k2, k3, k4, k5, k6 = jax.random.split(k, 6)
        wq = nrm(k1, (d_model, n_head * d_k))
        wk = nrm(k2, (d_model, n_head * d_k))
        wv = nrm(k3, (d_model, n_head * d_v))
        wo = nrm(k4, (n_head * d_v, d_model))
        w1 = nrm(k5, (d_model, d_inner))
        w2 = nrm(k6, (d_inner, d_model))
        vec = jnp.concatenate([
            row(jnp.ones((d_model,), jnp.float32)),    # ln1_g
            row(jnp.zeros((d_model,), jnp.float32)),   # ln1_b
            row(jnp.zeros((d_inner,), jnp.float32)),   # b1
            row(jnp.zeros((d_model,), jnp.float32)),   # b2
            row(jnp.ones((d_model,), jnp.float32)),    # ln2_g
            row(jnp.zeros((d_model,), jnp.float32)),   # ln2_b
            jnp.zeros((2, vdim), jnp.float32),         # padding rows
        ], axis=0)                                     # (8, vdim)
        return {
            "wq": head_split(wq, d_k).astype(_WEIGHT_DTYPE),
            "wk": head_split(wk, d_k).astype(_WEIGHT_DTYPE),
            "wv": head_split(wv, d_v).astype(_WEIGHT_DTYPE),
            "wo": wo.reshape(n_head, d_v, d_model).astype(_WEIGHT_DTYPE),
            "w1": w1.astype(_WEIGHT_DTYPE),
            "w2": w2.astype(_WEIGHT_DTYPE),
            "vecs": vec,
        }

    per_layer = [layer_params(k) for k in jax.random.split(keys[4], n_dec_layers)]
    p["layers"] = {name: jnp.stack([lp[name] for lp in per_layer])
                   for name in per_layer[0]}
    return p


def transformer_diffusion_forward(params, src, noise_t, condition, cfg,
                                  language_embedding=None, padding_mask=None):
    B, T, _ = src.shape
    S = T + 1
    D = cfg["d_model"]

    # src = cat((src, condition), dim=-1)
    x = jnp.concatenate([src, condition], axis=-1)            # (B, T, d_input)

    # time_mlp: SinusoidalPosEmb(64) -> Linear -> erf-GELU -> Linear (tiny,
    # left to XLA so it fuses; no extra kernel launches)
    t_four = sinusoidal_pos_emb(noise_t.astype(jnp.float32), 64)
    t_hid = jax.nn.gelu(t_four @ params["time_w1"] + params["time_b1"],
                        approximate=False)
    t_emb = t_hid @ params["time_w2"] + params["time_b2"]     # (B, d_model)
    if language_embedding is not None:
        t_emb = t_emb + language_embedding

    if padding_mask is None:
        padding_mask = jnp.ones((B, 1, S), jnp.float32)
    else:
        padding_mask = padding_mask.astype(jnp.float32)
    # additive key-padding bias precomputed once (not per layer)
    neg_bias = jnp.where(padding_mask > 0.0, 0.0, -1e9).astype(jnp.float32)

    pos_vec = jnp.arange(S) + 1
    pos_tab = sinusoid_table_from_positions(pos_vec, D)       # (S, d_model)

    out_full = fused_decoder_call(x, t_emb.reshape(B, 1, D), neg_bias,
                                  pos_tab, params, cfg)       # (B, S, d_pad)
    # drop the time token row and the lane padding
    return out_full[:, 1:, :cfg["d_feats"]]


# ----------------------------- main -------------------------------------------

if __name__ == "__main__":
    B, T = 2, 8
    d_feats, d_cond = 8, 8
    d_input_feats = d_feats + d_cond
    d_model, n_head, d_k, d_v = 32, 4, 8, 8
    n_dec_layers = 2
    d_inner = 2 * d_model
    cfg = dict(d_model=d_model, n_head=n_head, d_k=d_k, d_v=d_v, d_feats=d_feats)

    key = jax.random.PRNGKey(0)
    k_src, k_cond, k_t, k_par = jax.random.split(key, 4)
    src = jax.random.normal(k_src, (B, T, d_feats), jnp.float32)
    condition = jax.random.normal(k_cond, (B, T, d_cond), jnp.float32)
    noise_t = jax.random.randint(k_t, (B,), 0, 1000).astype(jnp.float32)

    params = init_params(k_par, d_input_feats, d_feats, d_model,
                         n_dec_layers, n_head, d_k, d_v, d_inner)

    out = transformer_diffusion_forward(params, src, noise_t, condition, cfg)
    out = jax.block_until_ready(out)
    assert out.shape == (B, T, d_feats), out.shape
    assert bool(jnp.all(jnp.isfinite(out)))
    print("KERNEL_OK")
</pallas_src>

<mosaic_0001>
module attributes {stable_mosaic.version = 11 : i64} {
  func.func @_fused_decoder_kernel(%arg0: i32, %arg1: i32, %arg2: memref<1x8x16xf32, #tpu.memory_space<vmem>>, %arg3: memref<1x1x32xf32, #tpu.memory_space<vmem>>, %arg4: memref<1x1x9xf32, #tpu.memory_space<vmem>>, %arg5: memref<9x32xf32, #tpu.memory_space<vmem>>, %arg6: memref<16x32xbf16, #tpu.memory_space<vmem>>, %arg7: memref<1x32xf32, #tpu.memory_space<vmem>>, %arg8: memref<1x4x32x8xbf16, #tpu.memory_space<vmem>>, %arg9: memref<1x4x32x8xbf16, #tpu.memory_space<vmem>>, %arg10: memref<1x4x32x8xbf16, #tpu.memory_space<vmem>>, %arg11: memref<1x4x8x32xbf16, #tpu.memory_space<vmem>>, %arg12: memref<1x32x64xbf16, #tpu.memory_space<vmem>>, %arg13: memref<1x64x32xbf16, #tpu.memory_space<vmem>>, %arg14: memref<1x8x64xf32, #tpu.memory_space<vmem>>, %arg15: memref<32x128xbf16, #tpu.memory_space<vmem>>, %arg16: memref<1x128xf32, #tpu.memory_space<vmem>>, %arg17: memref<1x9x128xf32, #tpu.memory_space<vmem>>, %arg18: memref<1x9x32xf32, #tpu.memory_space<vmem>>) attributes {dimension_semantics = [#tpu.dimension_semantics<parallel>, #tpu.dimension_semantics<arbitrary>], iteration_bounds = array<i64: 2, 2>, scalar_prefetch = 0 : i64, scratch_operands = 1 : i64, tpu.core_type = #tpu.core_type<tc>, window_params = [{transform_indices = @transform_0, window_bounds = array<i64: 1, 8, 16>}, {transform_indices = @transform_1, window_bounds = array<i64: 1, 1, 32>}, {transform_indices = @transform_2, window_bounds = array<i64: 1, 1, 9>}, {pipeline_mode = #tpu.pipeline_mode<synchronous>, transform_indices = @transform_3, window_bounds = array<i64: 9, 32>}, {pipeline_mode = #tpu.pipeline_mode<synchronous>, transform_indices = @transform_4, window_bounds = array<i64: 16, 32>}, {pipeline_mode = #tpu.pipeline_mode<synchronous>, transform_indices = @transform_5, window_bounds = array<i64: 1, 32>}, {transform_indices = @transform_6, window_bounds = array<i64: 1, 4, 32, 8>}, {transform_indices = @transform_7, window_bounds = array<i64: 1, 4, 32, 8>}, {transform_indices = @transform_8, window_bounds = array<i64: 1, 4, 32, 8>}, {transform_indices = @transform_9, window_bounds = array<i64: 1, 4, 8, 32>}, {transform_indices = @transform_10, window_bounds = array<i64: 1, 32, 64>}, {transform_indices = @transform_11, window_bounds = array<i64: 1, 64, 32>}, {transform_indices = @transform_12, window_bounds = array<i64: 1, 8, 64>}, {pipeline_mode = #tpu.pipeline_mode<synchronous>, transform_indices = @transform_13, window_bounds = array<i64: 32, 128>}, {pipeline_mode = #tpu.pipeline_mode<synchronous>, transform_indices = @transform_14, window_bounds = array<i64: 1, 128>}, {transform_indices = @transform_15, window_bounds = array<i64: 1, 9, 128>}]} {
    %c0_i32 = arith.constant 0 : i32
    %0 = arith.cmpi eq, %arg1, %c0_i32 : i32
    %1 = arith.extui %0 : i1 to i32
    %c0_i32_0 = arith.constant 0 : i32
    %2 = arith.cmpi ne, %1, %c0_i32_0 : i32
    scf.if %2 {
      %c0_129 = arith.constant 0 : index
      %c0_130 = arith.constant 0 : index
      %c0_131 = arith.constant 0 : index
      %233 = vector.load %arg2[%c0_129, %c0_130, %c0_131] : memref<1x8x16xf32, #tpu.memory_space<vmem>>, vector<1x8x16xf32>
      %234 = vector.shape_cast %233 : vector<1x8x16xf32> to vector<8x16xf32>
      %235 = arith.truncf %234 : vector<8x16xf32> to vector<8x16xbf16>
      %c0_132 = arith.constant 0 : index
      %c0_133 = arith.constant 0 : index
      %236 = vector.load %arg6[%c0_132, %c0_133] : memref<16x32xbf16, #tpu.memory_space<vmem>>, vector<16x32xbf16>
      %cst_134 = arith.constant dense<0.000000e+00> : vector<8x32xf32>
      %237 = tpu.matmul %235, %236, %cst_134 {dimension_numbers = #tpu.dot_dimension_numbers<[1], [0], [0], [1], [0, 0, 1, 1], [], []>} : vector<8x16xbf16>, vector<16x32xbf16>, vector<8x32xf32> -> vector<8x32xf32>
      %c0_135 = arith.constant 0 : index
      %c0_136 = arith.constant 0 : index
      %238 = vector.load %arg7[%c0_135, %c0_136] : memref<1x32xf32, #tpu.memory_space<vmem>>, vector<1x32xf32>
      %239 = vector.broadcast %238 : vector<1x32xf32> to vector<8x32xf32>
      %240 = arith.addf %237, %239 : vector<8x32xf32>
      %c0_137 = arith.constant 0 : index
      %c0_138 = arith.constant 0 : index
      %241 = vector.load %arg5[%c0_137, %c0_138] : memref<9x32xf32, #tpu.memory_space<vmem>>, vector<9x32xf32>
      %c0_139 = arith.constant 0 : index
      %c0_140 = arith.constant 0 : index
      %c0_141 = arith.constant 0 : index
      %242 = vector.load %arg3[%c0_139, %c0_140, %c0_141] : memref<1x1x32xf32, #tpu.memory_space<vmem>>, vector<1x1x32xf32>
      %243 = vector.extract_strided_slice %241 {offsets = [0, 0], sizes = [1, 32], strides = [1, 1]} : vector<9x32xf32> to vector<1x32xf32>
      %244 = vector.shape_cast %243 : vector<1x32xf32> to vector<1x1x32xf32>
      %245 = arith.addf %242, %244 : vector<1x1x32xf32>
      %c0_142 = arith.constant 0 : index
      %c0_143 = arith.constant 0 : index
      %c0_144 = arith.constant 0 : index
      %246 = vector.load %arg18[%c0_142, %c0_143, %c0_144] : memref<1x9x32xf32, #tpu.memory_space<vmem>>, vector<1x1x32xf32>
      tpu.vector_store %arg18[%c0_142, %c0_143, %c0_144], %245 {strides = array<i32>} : memref<1x9x32xf32, #tpu.memory_space<vmem>>, vector<1x1x32xf32>,
      %247 = vector.shape_cast %240 : vector<8x32xf32> to vector<1x8x32xf32>
      %248 = vector.extract_strided_slice %241 {offsets = [1, 0], sizes = [8, 32], strides = [1, 1]} : vector<9x32xf32> to vector<8x32xf32>
      %249 = vector.shape_cast %248 : vector<8x32xf32> to vector<1x8x32xf32>
      %250 = arith.addf %247, %249 : vector<1x8x32xf32>
      %c0_145 = arith.constant 0 : index
      %c1_146 = arith.constant 1 : index
      %c0_147 = arith.constant 0 : index
      %251 = vector.load %arg18[%c0_145, %c1_146, %c0_147] : memref<1x9x32xf32, #tpu.memory_space<vmem>>, vector<1x8x32xf32>
      tpu.vector_store %arg18[%c0_145, %c1_146, %c0_147], %250 {strides = array<i32>} : memref<1x9x32xf32, #tpu.memory_space<vmem>>, vector<1x8x32xf32>,
    } else {
    }
    %c0 = arith.constant 0 : index
    %c0_1 = arith.constant 0 : index
    %c0_2 = arith.constant 0 : index
    %3 = vector.load %arg18[%c0, %c0_1, %c0_2] : memref<1x9x32xf32, #tpu.memory_space<vmem>>, vector<1x9x32xf32>
    %4 = vector.shape_cast %3 : vector<1x9x32xf32> to vector<9x32xf32>
    %5 = arith.truncf %4 : vector<9x32xf32> to vector<9x32xbf16>
    %c0_3 = arith.constant 0 : index
    %c0_4 = arith.constant 0 : index
    %c0_5 = arith.constant 0 : index
    %6 = vector.load %arg14[%c0_3, %c0_4, %c0_5] : memref<1x8x64xf32, #tpu.memory_space<vmem>>, vector<1x8x64xf32>
    %7 = vector.shape_cast %6 : vector<1x8x64xf32> to vector<8x64xf32>
    %8 = vector.extract_strided_slice %7 {offsets = [0, 0], sizes = [1, 32], strides = [1, 1]} : vector<8x64xf32> to vector<1x32xf32>
    %9 = vector.extract_strided_slice %7 {offsets = [1, 0], sizes = [1, 32], strides = [1, 1]} : vector<8x64xf32> to vector<1x32xf32>
    %10 = vector.extract_strided_slice %7 {offsets = [2, 0], sizes = [1, 64], strides = [1, 1]} : vector<8x64xf32> to vector<1x64xf32>
    %11 = vector.extract_strided_slice %7 {offsets = [3, 0], sizes = [1, 32], strides = [1, 1]} : vector<8x64xf32> to vector<1x32xf32>
    %12 = vector.extract_strided_slice %7 {offsets = [4, 0], sizes = [1, 32], strides = [1, 1]} : vector<8x64xf32> to vector<1x32xf32>
    %13 = vector.extract_strided_slice %7 {offsets = [5, 0], sizes = [1, 32], strides = [1, 1]} : vector<8x64xf32> to vector<1x32xf32>
    %c0_6 = arith.constant 0 : index
    %c0_7 = arith.constant 0 : index
    %c0_8 = arith.constant 0 : index
    %14 = vector.load %arg4[%c0_6, %c0_7, %c0_8] : memref<1x1x9xf32, #tpu.memory_space<vmem>>, vector<1x1x9xf32>
    %cst = arith.constant 0.000000e+00 : f32
    %15 = vector.broadcast %cst : f32 to vector<9x32xf32>
    %c0_9 = arith.constant 0 : index
    %c0_10 = arith.constant 0 : index
    %c0_11 = arith.constant 0 : index
    %c0_12 = arith.constant 0 : index
    %16 = vector.load %arg8[%c0_9, %c0_10, %c0_11, %c0_12] : memref<1x4x32x8xbf16, #tpu.memory_space<vmem>>, vector<1x1x32x8xbf16>
    %17 = vector.shape_cast %16 : vector<1x1x32x8xbf16> to vector<32x8xbf16>
    %cst_13 = arith.constant dense<0.000000e+00> : vector<9x8xf32>
    %18 = tpu.matmul %5, %17, %cst_13 {dimension_numbers = #tpu.dot_dimension_numbers<[1], [0], [0], [1], [0, 0, 1, 1], [], []>} : vector<9x32xbf16>, vector<32x8xbf16>, vector<9x8xf32> -> vector<9x8xf32>
    %c0_14 = arith.constant 0 : index
    %c0_15 = arith.constant 0 : index
    %c0_16 = arith.constant 0 : index
    %c0_17 = arith.constant 0 : index
    %19 = vector.load %arg9[%c0_14, %c0_15, %c0_16, %c0_17] : memref<1x4x32x8xbf16, #tpu.memory_space<vmem>>, vector<1x1x32x8xbf16>
    %20 = vector.shape_cast %19 : vector<1x1x32x8xbf16> to vector<32x8xbf16>
    %cst_18 = arith.constant dense<0.000000e+00> : vector<9x8xf32>
    %21 = tpu.matmul %5, %20, %cst_18 {dimension_numbers = #tpu.dot_dimension_numbers<[1], [0], [0], [1], [0, 0, 1, 1], [], []>} : vector<9x32xbf16>, vector<32x8xbf16>, vector<9x8xf32> -> vector<9x8xf32>
    %c0_19 = arith.constant 0 : index
    %c0_20 = arith.constant 0 : index
    %c0_21 = arith.constant 0 : index
    %c0_22 = arith.constant 0 : index
    %22 = vector.load %arg10[%c0_19, %c0_20, %c0_21, %c0_22] : memref<1x4x32x8xbf16, #tpu.memory_space<vmem>>, vector<1x1x32x8xbf16>
    %23 = vector.shape_cast %22 : vector<1x1x32x8xbf16> to vector<32x8xbf16>
    %cst_23 = arith.constant dense<0.000000e+00> : vector<9x8xf32>
    %24 = tpu.matmul %5, %23, %cst_23 {dimension_numbers = #tpu.dot_dimension_numbers<[1], [0], [0], [1], [0, 0, 1, 1], [], []>} : vector<9x32xbf16>, vector<32x8xbf16>, vector<9x8xf32> -> vector<9x8xf32>
    %25 = vector.shape_cast %18 : vector<9x8xf32> to vector<1x9x8xf32>
    %26 = arith.truncf %25 : vector<1x9x8xf32> to vector<1x9x8xbf16>
    %27 = vector.shape_cast %21 : vector<9x8xf32> to vector<1x9x8xf32>
    %28 = arith.truncf %27 : vector<1x9x8xf32> to vector<1x9x8xbf16>
    %29 = vector.shape_cast %24 : vector<9x8xf32> to vector<1x9x8xf32>
    %30 = arith.truncf %29 : vector<1x9x8xf32> to vector<1x9x8xbf16>
    "tpu.trace_start"() <{level = 10 : i32, message = "bqd,bkd->bqk"}> : () -> ()
    %cst_24 = arith.constant dense<0.000000e+00> : vector<1x9x9xf32>
    %31 = tpu.matmul %26, %28, %cst_24 {dimension_numbers = #tpu.dot_dimension_numbers<[2], [2], [1], [1], [0, 0, 0, 1, 1, 1], [0], [0]>} : vector<1x9x8xbf16>, vector<1x9x8xbf16>, vector<1x9x9xf32> -> vector<1x9x9xf32>
    "tpu.trace_stop"() : () -> ()
    %cst_25 = arith.constant 0.353553385 : f32
    %32 = vector.broadcast %cst_25 : f32 to vector<1x9x9xf32>
    %33 = arith.mulf %31, %32 : vector<1x9x9xf32>
    %34 = vector.broadcast %14 : vector<1x1x9xf32> to vector<1x9x9xf32>
    %35 = arith.addf %33, %34 : vector<1x9x9xf32>
    %cst_26 = arith.constant dense<0xFF800000> : vector<1x9xf32>
    %36 = vector.multi_reduction <maximumf>, %35, %cst_26 [2] : vector<1x9x9xf32> to vector<1x9xf32>
    %37 = vector.shape_cast %36 : vector<1x9xf32> to vector<1x9x1xf32>
    %38 = vector.broadcast %37 : vector<1x9x1xf32> to vector<1x9x9xf32>
    %39 = arith.subf %35, %38 : vector<1x9x9xf32>
    %40 = math.exp %39 : vector<1x9x9xf32>
    %cst_27 = arith.constant dense<0.000000e+00> : vector<1x9xf32>
    %41 = vector.multi_reduction <add>, %40, %cst_27 [2] : vector<1x9x9xf32> to vector<1x9xf32>
    %42 = vector.shape_cast %41 : vector<1x9xf32> to vector<1x9x1xf32>
    %43 = tpu.reciprocal %42 {approx = true} : vector<1x9x1xf32> -> vector<1x9x1xf32>
    %44 = vector.broadcast %43 : vector<1x9x1xf32> to vector<1x9x9xf32>
    %45 = arith.mulf %40, %44 : vector<1x9x9xf32>
    %46 = arith.truncf %45 : vector<1x9x9xf32> to vector<1x9x9xbf16>
    "tpu.trace_start"() <{level = 10 : i32, message = "bqk,bkd->bqd"}> : () -> ()
    %cst_28 = arith.constant dense<0.000000e+00> : vector<1x9x8xf32>
    %47 = tpu.matmul %46, %30, %cst_28 {dimension_numbers = #tpu.dot_dimension_numbers<[2], [1], [1], [2], [0, 0, 0, 1, 1, 2], [0], [0]>} : vector<1x9x9xbf16>, vector<1x9x8xbf16>, vector<1x9x8xf32> -> vector<1x9x8xf32>
    "tpu.trace_stop"() : () -> ()
    %48 = vector.shape_cast %47 : vector<1x9x8xf32> to vector<9x8xf32>
    %49 = arith.truncf %48 : vector<9x8xf32> to vector<9x8xbf16>
    %c0_29 = arith.constant 0 : index
    %c0_30 = arith.constant 0 : index
    %c0_31 = arith.constant 0 : index
    %c0_32 = arith.constant 0 : index
    %50 = vector.load %arg11[%c0_29, %c0_30, %c0_31, %c0_32] : memref<1x4x8x32xbf16, #tpu.memory_space<vmem>>, vector<1x1x8x32xbf16>
    %51 = vector.shape_cast %50 : vector<1x1x8x32xbf16> to vector<8x32xbf16>
    %cst_33 = arith.constant dense<0.000000e+00> : vector<9x32xf32>
    %52 = tpu.matmul %49, %51, %cst_33 {dimension_numbers = #tpu.dot_dimension_numbers<[1], [0], [0], [1], [0, 0, 1, 1], [], []>} : vector<9x8xbf16>, vector<8x32xbf16>, vector<9x32xf32> -> vector<9x32xf32>
    %53 = arith.addf %15, %52 : vector<9x32xf32>
    %c0_34 = arith.constant 0 : index
    %c1 = arith.constant 1 : index
    %c0_35 = arith.constant 0 : index
    %c0_36 = arith.constant 0 : index
    %54 = vector.load %arg8[%c0_34, %c1, %c0_35, %c0_36] : memref<1x4x32x8xbf16, #tpu.memory_space<vmem>>, vector<1x1x32x8xbf16>
    %55 = vector.shape_cast %54 : vector<1x1x32x8xbf16> to vector<32x8xbf16>
    %cst_37 = arith.constant dense<0.000000e+00> : vector<9x8xf32>
    %56 = tpu.matmul %5, %55, %cst_37 {dimension_numbers = #tpu.dot_dimension_numbers<[1], [0], [0], [1], [0, 0, 1, 1], [], []>} : vector<9x32xbf16>, vector<32x8xbf16>, vector<9x8xf32> -> vector<9x8xf32>
    %c0_38 = arith.constant 0 : index
    %c1_39 = arith.constant 1 : index
    %c0_40 = arith.constant 0 : index
    %c0_41 = arith.constant 0 : index
    %57 = vector.load %arg9[%c0_38, %c1_39, %c0_40, %c0_41] : memref<1x4x32x8xbf16, #tpu.memory_space<vmem>>, vector<1x1x32x8xbf16>
    %58 = vector.shape_cast %57 : vector<1x1x32x8xbf16> to vector<32x8xbf16>
    %cst_42 = arith.constant dense<0.000000e+00> : vector<9x8xf32>
    %59 = tpu.matmul %5, %58, %cst_42 {dimension_numbers = #tpu.dot_dimension_numbers<[1], [0], [0], [1], [0, 0, 1, 1], [], []>} : vector<9x32xbf16>, vector<32x8xbf16>, vector<9x8xf32> -> vector<9x8xf32>
    %c0_43 = arith.constant 0 : index
    %c1_44 = arith.constant 1 : index
    %c0_45 = arith.constant 0 : index
    %c0_46 = arith.constant 0 : index
    %60 = vector.load %arg10[%c0_43, %c1_44, %c0_45, %c0_46] : memref<1x4x32x8xbf16, #tpu.memory_space<vmem>>, vector<1x1x32x8xbf16>
    %61 = vector.shape_cast %60 : vector<1x1x32x8xbf16> to vector<32x8xbf16>
    %cst_47 = arith.constant dense<0.000000e+00> : vector<9x8xf32>
    %62 = tpu.matmul %5, %61, %cst_47 {dimension_numbers = #tpu.dot_dimension_numbers<[1], [0], [0], [1], [0, 0, 1, 1], [], []>} : vector<9x32xbf16>, vector<32x8xbf16>, vector<9x8xf32> -> vector<9x8xf32>
    %63 = vector.shape_cast %56 : vector<9x8xf32> to vector<1x9x8xf32>
    %64 = arith.truncf %63 : vector<1x9x8xf32> to vector<1x9x8xbf16>
    %65 = vector.shape_cast %59 : vector<9x8xf32> to vector<1x9x8xf32>
    %66 = arith.truncf %65 : vector<1x9x8xf32> to vector<1x9x8xbf16>
    %67 = vector.shape_cast %62 : vector<9x8xf32> to vector<1x9x8xf32>
    %68 = arith.truncf %67 : vector<1x9x8xf32> to vector<1x9x8xbf16>
    "tpu.trace_start"() <{level = 10 : i32, message = "bqd,bkd->bqk"}> : () -> ()
    %cst_48 = arith.constant dense<0.000000e+00> : vector<1x9x9xf32>
    %69 = tpu.matmul %64, %66, %cst_48 {dimension_numbers = #tpu.dot_dimension_numbers<[2], [2], [1], [1], [0, 0, 0, 1, 1, 1], [0], [0]>} : vector<1x9x8xbf16>, vector<1x9x8xbf16>, vector<1x9x9xf32> -> vector<1x9x9xf32>
    "tpu.trace_stop"() : () -> ()
    %cst_49 = arith.constant 0.353553385 : f32
    %70 = vector.broadcast %cst_49 : f32 to vector<1x9x9xf32>
    %71 = arith.mulf %69, %70 : vector<1x9x9xf32>
    %72 = vector.broadcast %14 : vector<1x1x9xf32> to vector<1x9x9xf32>
    %73 = arith.addf %71, %72 : vector<1x9x9xf32>
    %cst_50 = arith.constant dense<0xFF800000> : vector<1x9xf32>
    %74 = vector.multi_reduction <maximumf>, %73, %cst_50 [2] : vector<1x9x9xf32> to vector<1x9xf32>
    %75 = vector.shape_cast %74 : vector<1x9xf32> to vector<1x9x1xf32>
    %76 = vector.broadcast %75 : vector<1x9x1xf32> to vector<1x9x9xf32>
    %77 = arith.subf %73, %76 : vector<1x9x9xf32>
    %78 = math.exp %77 : vector<1x9x9xf32>
    %cst_51 = arith.constant dense<0.000000e+00> : vector<1x9xf32>
    %79 = vector.multi_reduction <add>, %78, %cst_51 [2] : vector<1x9x9xf32> to vector<1x9xf32>
    %80 = vector.shape_cast %79 : vector<1x9xf32> to vector<1x9x1xf32>
    %81 = tpu.reciprocal %80 {approx = true} : vector<1x9x1xf32> -> vector<1x9x1xf32>
    %82 = vector.broadcast %81 : vector<1x9x1xf32> to vector<1x9x9xf32>
    %83 = arith.mulf %78, %82 : vector<1x9x9xf32>
    %84 = arith.truncf %83 : vector<1x9x9xf32> to vector<1x9x9xbf16>
    "tpu.trace_start"() <{level = 10 : i32, message = "bqk,bkd->bqd"}> : () -> ()
    %cst_52 = arith.constant dense<0.000000e+00> : vector<1x9x8xf32>
    %85 = tpu.matmul %84, %68, %cst_52 {dimension_numbers = #tpu.dot_dimension_numbers<[2], [1], [1], [2], [0, 0, 0, 1, 1, 2], [0], [0]>} : vector<1x9x9xbf16>, vector<1x9x8xbf16>, vector<1x9x8xf32> -> vector<1x9x8xf32>
    "tpu.trace_stop"() : () -> ()
    %86 = vector.shape_cast %85 : vector<1x9x8xf32> to vector<9x8xf32>
    %87 = arith.truncf %86 : vector<9x8xf32> to vector<9x8xbf16>
    %c0_53 = arith.constant 0 : index
    %c1_54 = arith.constant 1 : index
    %c0_55 = arith.constant 0 : index
    %c0_56 = arith.constant 0 : index
    %88 = vector.load %arg11[%c0_53, %c1_54, %c0_55, %c0_56] : memref<1x4x8x32xbf16, #tpu.memory_space<vmem>>, vector<1x1x8x32xbf16>
    %89 = vector.shape_cast %88 : vector<1x1x8x32xbf16> to vector<8x32xbf16>
    %cst_57 = arith.constant dense<0.000000e+00> : vector<9x32xf32>
    %90 = tpu.matmul %87, %89, %cst_57 {dimension_numbers = #tpu.dot_dimension_numbers<[1], [0], [0], [1], [0, 0, 1, 1], [], []>} : vector<9x8xbf16>, vector<8x32xbf16>, vector<9x32xf32> -> vector<9x32xf32>
    %91 = arith.addf %53, %90 : vector<9x32xf32>
    %c0_58 = arith.constant 0 : index
    %c2 = arith.constant 2 : index
    %c0_59 = arith.constant 0 : index
    %c0_60 = arith.constant 0 : index
    %92 = vector.load %arg8[%c0_58, %c2, %c0_59, %c0_60] : memref<1x4x32x8xbf16, #tpu.memory_space<vmem>>, vector<1x1x32x8xbf16>
    %93 = vector.shape_cast %92 : vector<1x1x32x8xbf16> to vector<32x8xbf16>
    %cst_61 = arith.constant dense<0.000000e+00> : vector<9x8xf32>
    %94 = tpu.matmul %5, %93, %cst_61 {dimension_numbers = #tpu.dot_dimension_numbers<[1], [0], [0], [1], [0, 0, 1, 1], [], []>} : vector<9x32xbf16>, vector<32x8xbf16>, vector<9x8xf32> -> vector<9x8xf32>
    %c0_62 = arith.constant 0 : index
    %c2_63 = arith.constant 2 : index
    %c0_64 = arith.constant 0 : index
    %c0_65 = arith.constant 0 : index
    %95 = vector.load %arg9[%c0_62, %c2_63, %c0_64, %c0_65] : memref<1x4x32x8xbf16, #tpu.memory_space<vmem>>, vector<1x1x32x8xbf16>
    %96 = vector.shape_cast %95 : vector<1x1x32x8xbf16> to vector<32x8xbf16>
    %cst_66 = arith.constant dense<0.000000e+00> : vector<9x8xf32>
    %97 = tpu.matmul %5, %96, %cst_66 {dimension_numbers = #tpu.dot_dimension_numbers<[1], [0], [0], [1], [0, 0, 1, 1], [], []>} : vector<9x32xbf16>, vector<32x8xbf16>, vector<9x8xf32> -> vector<9x8xf32>
    %c0_67 = arith.constant 0 : index
    %c2_68 = arith.constant 2 : index
    %c0_69 = arith.constant 0 : index
    %c0_70 = arith.constant 0 : index
    %98 = vector.load %arg10[%c0_67, %c2_68, %c0_69, %c0_70] : memref<1x4x32x8xbf16, #tpu.memory_space<vmem>>, vector<1x1x32x8xbf16>
    %99 = vector.shape_cast %98 : vector<1x1x32x8xbf16> to vector<32x8xbf16>
    %cst_71 = arith.constant dense<0.000000e+00> : vector<9x8xf32>
    %100 = tpu.matmul %5, %99, %cst_71 {dimension_numbers = #tpu.dot_dimension_numbers<[1], [0], [0], [1], [0, 0, 1, 1], [], []>} : vector<9x32xbf16>, vector<32x8xbf16>, vector<9x8xf32> -> vector<9x8xf32>
    %101 = vector.shape_cast %94 : vector<9x8xf32> to vector<1x9x8xf32>
    %102 = arith.truncf %101 : vector<1x9x8xf32> to vector<1x9x8xbf16>
    %103 = vector.shape_cast %97 : vector<9x8xf32> to vector<1x9x8xf32>
    %104 = arith.truncf %103 : vector<1x9x8xf32> to vector<1x9x8xbf16>
    %105 = vector.shape_cast %100 : vector<9x8xf32> to vector<1x9x8xf32>
    %106 = arith.truncf %105 : vector<1x9x8xf32> to vector<1x9x8xbf16>
    "tpu.trace_start"() <{level = 10 : i32, message = "bqd,bkd->bqk"}> : () -> ()
    %cst_72 = arith.constant dense<0.000000e+00> : vector<1x9x9xf32>
    %107 = tpu.matmul %102, %104, %cst_72 {dimension_numbers = #tpu.dot_dimension_numbers<[2], [2], [1], [1], [0, 0, 0, 1, 1, 1], [0], [0]>} : vector<1x9x8xbf16>, vector<1x9x8xbf16>, vector<1x9x9xf32> -> vector<1x9x9xf32>
    "tpu.trace_stop"() : () -> ()
    %cst_73 = arith.constant 0.353553385 : f32
    %108 = vector.broadcast %cst_73 : f32 to vector<1x9x9xf32>
    %109 = arith.mulf %107, %108 : vector<1x9x9xf32>
    %110 = vector.broadcast %14 : vector<1x1x9xf32> to vector<1x9x9xf32>
    %111 = arith.addf %109, %110 : vector<1x9x9xf32>
    %cst_74 = arith.constant dense<0xFF800000> : vector<1x9xf32>
    %112 = vector.multi_reduction <maximumf>, %111, %cst_74 [2] : vector<1x9x9xf32> to vector<1x9xf32>
    %113 = vector.shape_cast %112 : vector<1x9xf32> to vector<1x9x1xf32>
    %114 = vector.broadcast %113 : vector<1x9x1xf32> to vector<1x9x9xf32>
    %115 = arith.subf %111, %114 : vector<1x9x9xf32>
    %116 = math.exp %115 : vector<1x9x9xf32>
    %cst_75 = arith.constant dense<0.000000e+00> : vector<1x9xf32>
    %117 = vector.multi_reduction <add>, %116, %cst_75 [2] : vector<1x9x9xf32> to vector<1x9xf32>
    %118 = vector.shape_cast %117 : vector<1x9xf32> to vector<1x9x1xf32>
    %119 = tpu.reciprocal %118 {approx = true} : vector<1x9x1xf32> -> vector<1x9x1xf32>
    %120 = vector.broadcast %119 : vector<1x9x1xf32> to vector<1x9x9xf32>
    %121 = arith.mulf %116, %120 : vector<1x9x9xf32>
    %122 = arith.truncf %121 : vector<1x9x9xf32> to vector<1x9x9xbf16>
    "tpu.trace_start"() <{level = 10 : i32, message = "bqk,bkd->bqd"}> : () -> ()
    %cst_76 = arith.constant dense<0.000000e+00> : vector<1x9x8xf32>
    %123 = tpu.matmul %122, %106, %cst_76 {dimension_numbers = #tpu.dot_dimension_numbers<[2], [1], [1], [2], [0, 0, 0, 1, 1, 2], [0], [0]>} : vector<1x9x9xbf16>, vector<1x9x8xbf16>, vector<1x9x8xf32> -> vector<1x9x8xf32>
    "tpu.trace_stop"() : () -> ()
    %124 = vector.shape_cast %123 : vector<1x9x8xf32> to vector<9x8xf32>
    %125 = arith.truncf %124 : vector<9x8xf32> to vector<9x8xbf16>
    %c0_77 = arith.constant 0 : index
    %c2_78 = arith.constant 2 : index
    %c0_79 = arith.constant 0 : index
    %c0_80 = arith.constant 0 : index
    %126 = vector.load %arg11[%c0_77, %c2_78, %c0_79, %c0_80] : memref<1x4x8x32xbf16, #tpu.memory_space<vmem>>, vector<1x1x8x32xbf16>
    %127 = vector.shape_cast %126 : vector<1x1x8x32xbf16> to vector<8x32xbf16>
    %cst_81 = arith.constant dense<0.000000e+00> : vector<9x32xf32>
    %128 = tpu.matmul %125, %127, %cst_81 {dimension_numbers = #tpu.dot_dimension_numbers<[1], [0], [0], [1], [0, 0, 1, 1], [], []>} : vector<9x8xbf16>, vector<8x32xbf16>, vector<9x32xf32> -> vector<9x32xf32>
    %129 = arith.addf %91, %128 : vector<9x32xf32>
    %c0_82 = arith.constant 0 : index
    %c3 = arith.constant 3 : index
    %c0_83 = arith.constant 0 : index
    %c0_84 = arith.constant 0 : index
    %130 = vector.load %arg8[%c0_82, %c3, %c0_83, %c0_84] : memref<1x4x32x8xbf16, #tpu.memory_space<vmem>>, vector<1x1x32x8xbf16>
    %131 = vector.shape_cast %130 : vector<1x1x32x8xbf16> to vector<32x8xbf16>
    %cst_85 = arith.constant dense<0.000000e+00> : vector<9x8xf32>
    %132 = tpu.matmul %5, %131, %cst_85 {dimension_numbers = #tpu.dot_dimension_numbers<[1], [0], [0], [1], [0, 0, 1, 1], [], []>} : vector<9x32xbf16>, vector<32x8xbf16>, vector<9x8xf32> -> vector<9x8xf32>
    %c0_86 = arith.constant 0 : index
    %c3_87 = arith.constant 3 : index
    %c0_88 = arith.constant 0 : index
    %c0_89 = arith.constant 0 : index
    %133 = vector.load %arg9[%c0_86, %c3_87, %c0_88, %c0_89] : memref<1x4x32x8xbf16, #tpu.memory_space<vmem>>, vector<1x1x32x8xbf16>
    %134 = vector.shape_cast %133 : vector<1x1x32x8xbf16> to vector<32x8xbf16>
    %cst_90 = arith.constant dense<0.000000e+00> : vector<9x8xf32>
    %135 = tpu.matmul %5, %134, %cst_90 {dimension_numbers = #tpu.dot_dimension_numbers<[1], [0], [0], [1], [0, 0, 1, 1], [], []>} : vector<9x32xbf16>, vector<32x8xbf16>, vector<9x8xf32> -> vector<9x8xf32>
    %c0_91 = arith.constant 0 : index
    %c3_92 = arith.constant 3 : index
    %c0_93 = arith.constant 0 : index
    %c0_94 = arith.constant 0 : index
    %136 = vector.load %arg10[%c0_91, %c3_92, %c0_93, %c0_94] : memref<1x4x32x8xbf16, #tpu.memory_space<vmem>>, vector<1x1x32x8xbf16>
    %137 = vector.shape_cast %136 : vector<1x1x32x8xbf16> to vector<32x8xbf16>
    %cst_95 = arith.constant dense<0.000000e+00> : vector<9x8xf32>
    %138 = tpu.matmul %5, %137, %cst_95 {dimension_numbers = #tpu.dot_dimension_numbers<[1], [0], [0], [1], [0, 0, 1, 1], [], []>} : vector<9x32xbf16>, vector<32x8xbf16>, vector<9x8xf32> -> vector<9x8xf32>
    %139 = vector.shape_cast %132 : vector<9x8xf32> to vector<1x9x8xf32>
    %140 = arith.truncf %139 : vector<1x9x8xf32> to vector<1x9x8xbf16>
    %141 = vector.shape_cast %135 : vector<9x8xf32> to vector<1x9x8xf32>
    %142 = arith.truncf %141 : vector<1x9x8xf32> to vector<1x9x8xbf16>
    %143 = vector.shape_cast %138 : vector<9x8xf32> to vector<1x9x8xf32>
    %144 = arith.truncf %143 : vector<1x9x8xf32> to vector<1x9x8xbf16>
    "tpu.trace_start"() <{level = 10 : i32, message = "bqd,bkd->bqk"}> : () -> ()
    %cst_96 = arith.constant dense<0.000000e+00> : vector<1x9x9xf32>
    %145 = tpu.matmul %140, %142, %cst_96 {dimension_numbers = #tpu.dot_dimension_numbers<[2], [2], [1], [1], [0, 0, 0, 1, 1, 1], [0], [0]>} : vector<1x9x8xbf16>, vector<1x9x8xbf16>, vector<1x9x9xf32> -> vector<1x9x9xf32>
    "tpu.trace_stop"() : () -> ()
    %cst_97 = arith.constant 0.353553385 : f32
    %146 = vector.broadcast %cst_97 : f32 to vector<1x9x9xf32>
    %147 = arith.mulf %145, %146 : vector<1x9x9xf32>
    %148 = vector.broadcast %14 : vector<1x1x9xf32> to vector<1x9x9xf32>
    %149 = arith.addf %147, %148 : vector<1x9x9xf32>
    %cst_98 = arith.constant dense<0xFF800000> : vector<1x9xf32>
    %150 = vector.multi_reduction <maximumf>, %149, %cst_98 [2] : vector<1x9x9xf32> to vector<1x9xf32>
    %151 = vector.shape_cast %150 : vector<1x9xf32> to vector<1x9x1xf32>
    %152 = vector.broadcast %151 : vector<1x9x1xf32> to vector<1x9x9xf32>
    %153 = arith.subf %149, %152 : vector<1x9x9xf32>
    %154 = math.exp %153 : vector<1x9x9xf32>
    %cst_99 = arith.constant dense<0.000000e+00> : vector<1x9xf32>
    %155 = vector.multi_reduction <add>, %154, %cst_99 [2] : vector<1x9x9xf32> to vector<1x9xf32>
    %156 = vector.shape_cast %155 : vector<1x9xf32> to vector<1x9x1xf32>
    %157 = tpu.reciprocal %156 {approx = true} : vector<1x9x1xf32> -> vector<1x9x1xf32>
    %158 = vector.broadcast %157 : vector<1x9x1xf32> to vector<1x9x9xf32>
    %159 = arith.mulf %154, %158 : vector<1x9x9xf32>
    %160 = arith.truncf %159 : vector<1x9x9xf32> to vector<1x9x9xbf16>
    "tpu.trace_start"() <{level = 10 : i32, message = "bqk,bkd->bqd"}> : () -> ()
    %cst_100 = arith.constant dense<0.000000e+00> : vector<1x9x8xf32>
    %161 = tpu.matmul %160, %144, %cst_100 {dimension_numbers = #tpu.dot_dimension_numbers<[2], [1], [1], [2], [0, 0, 0, 1, 1, 2], [0], [0]>} : vector<1x9x9xbf16>, vector<1x9x8xbf16>, vector<1x9x8xf32> -> vector<1x9x8xf32>
    "tpu.trace_stop"() : () -> ()
    %162 = vector.shape_cast %161 : vector<1x9x8xf32> to vector<9x8xf32>
    %163 = arith.truncf %162 : vector<9x8xf32> to vector<9x8xbf16>
    %c0_101 = arith.constant 0 : index
    %c3_102 = arith.constant 3 : index
    %c0_103 = arith.constant 0 : index
    %c0_104 = arith.constant 0 : index
    %164 = vector.load %arg11[%c0_101, %c3_102, %c0_103, %c0_104] : memref<1x4x8x32xbf16, #tpu.memory_space<vmem>>, vector<1x1x8x32xbf16>
    %165 = vector.shape_cast %164 : vector<1x1x8x32xbf16> to vector<8x32xbf16>
    %cst_105 = arith.constant dense<0.000000e+00> : vector<9x32xf32>
    %166 = tpu.matmul %163, %165, %cst_105 {dimension_numbers = #tpu.dot_dimension_numbers<[1], [0], [0], [1], [0, 0, 1, 1], [], []>} : vector<9x8xbf16>, vector<8x32xbf16>, vector<9x32xf32> -> vector<9x32xf32>
    %167 = arith.addf %129, %166 : vector<9x32xf32>
    %168 = arith.addf %167, %4 : vector<9x32xf32>
    %cst_106 = arith.constant dense<0.000000e+00> : vector<9xf32>
    %169 = vector.multi_reduction <add>, %168, %cst_106 [1] : vector<9x32xf32> to vector<9xf32>
    %170 = vector.shape_cast %169 : vector<9xf32> to vector<9x1xf32>
    %cst_107 = arith.constant 3.200000e+01 : f32
    %171 = vector.broadcast %cst_107 : f32 to vector<9x1xf32>
    %172 = arith.divf %170, %171 : vector<9x1xf32>
    %173 = vector.broadcast %172 : vector<9x1xf32> to vector<9x32xf32>
    %174 = arith.subf %168, %173 : vector<9x32xf32>
    %175 = arith.mulf %174, %174 : vector<9x32xf32>
    %cst_108 = arith.constant dense<0.000000e+00> : vector<9xf32>
    %176 = vector.multi_reduction <add>, %175, %cst_108 [1] : vector<9x32xf32> to vector<9xf32>
    %177 = vector.shape_cast %176 : vector<9xf32> to vector<9x1xf32>
    %cst_109 = arith.constant 3.200000e+01 : f32
    %178 = vector.broadcast %cst_109 : f32 to vector<9x1xf32>
    %179 = arith.divf %177, %178 : vector<9x1xf32>
    %180 = vector.broadcast %172 : vector<9x1xf32> to vector<9x32xf32>
    %181 = arith.subf %168, %180 : vector<9x32xf32>
    %cst_110 = arith.constant 9.99999997E-7 : f32
    %182 = vector.broadcast %cst_110 : f32 to vector<9x1xf32>
    %183 = arith.addf %179, %182 : vector<9x1xf32>
    %184 = math.rsqrt %183 : vector<9x1xf32>
    %185 = vector.broadcast %184 : vector<9x1xf32> to vector<9x32xf32>
    %186 = arith.mulf %181, %185 : vector<9x32xf32>
    %187 = vector.broadcast %8 : vector<1x32xf32> to vector<9x32xf32>
    %188 = arith.mulf %186, %187 : vector<9x32xf32>
    %189 = vector.broadcast %9 : vector<1x32xf32> to vector<9x32xf32>
    %190 = arith.addf %188, %189 : vector<9x32xf32>
    %191 = arith.truncf %190 : vector<9x32xf32> to vector<9x32xbf16>
    %c0_111 = arith.constant 0 : index
    %c0_112 = arith.constant 0 : index
    %c0_113 = arith.constant 0 : index
    %192 = vector.load %arg12[%c0_111, %c0_112, %c0_113] : memref<1x32x64xbf16, #tpu.memory_space<vmem>>, vector<1x32x64xbf16>
    %193 = vector.shape_cast %192 : vector<1x32x64xbf16> to vector<32x64xbf16>
    %cst_114 = arith.constant dense<0.000000e+00> : vector<9x64xf32>
    %194 = tpu.matmul %191, %193, %cst_114 {dimension_numbers = #tpu.dot_dimension_numbers<[1], [0], [0], [1], [0, 0, 1, 1], [], []>} : vector<9x32xbf16>, vector<32x64xbf16>, vector<9x64xf32> -> vector<9x64xf32>
    %195 = vector.broadcast %10 : vector<1x64xf32> to vector<9x64xf32>
    %196 = arith.addf %194, %195 : vector<9x64xf32>
    %cst_115 = arith.constant 0.000000e+00 : f32
    %197 = vector.broadcast %cst_115 : f32 to vector<9x64xf32>
    %198 = arith.maximumf %196, %197 : vector<9x64xf32>
    %199 = arith.truncf %198 : vector<9x64xf32> to vector<9x64xbf16>
    %c0_116 = arith.constant 0 : index
    %c0_117 = arith.constant 0 : index
    %c0_118 = arith.constant 0 : index
    %200 = vector.load %arg13[%c0_116, %c0_117, %c0_118] : memref<1x64x32xbf16, #tpu.memory_space<vmem>>, vector<1x64x32xbf16>
    %201 = vector.shape_cast %200 : vector<1x64x32xbf16> to vector<64x32xbf16>
    %cst_119 = arith.constant dense<0.000000e+00> : vector<9x32xf32>
    %202 = tpu.matmul %199, %201, %cst_119 {dimension_numbers = #tpu.dot_dimension_numbers<[1], [0], [0], [1], [0, 0, 1, 1], [], []>} : vector<9x64xbf16>, vector<64x32xbf16>, vector<9x32xf32> -> vector<9x32xf32>
    %203 = vector.broadcast %11 : vector<1x32xf32> to vector<9x32xf32>
    %204 = arith.addf %202, %203 : vector<9x32xf32>
    %205 = arith.addf %204, %190 : vector<9x32xf32>
    %cst_120 = arith.constant dense<0.000000e+00> : vector<9xf32>
    %206 = vector.multi_reduction <add>, %205, %cst_120 [1] : vector<9x32xf32> to vector<9xf32>
    %207 = vector.shape_cast %206 : vector<9xf32> to vector<9x1xf32>
    %cst_121 = arith.constant 3.200000e+01 : f32
    %208 = vector.broadcast %cst_121 : f32 to vector<9x1xf32>
    %209 = arith.divf %207, %208 : vector<9x1xf32>
    %210 = vector.broadcast %209 : vector<9x1xf32> to vector<9x32xf32>
    %211 = arith.subf %205, %210 : vector<9x32xf32>
    %212 = arith.mulf %211, %211 : vector<9x32xf32>
    %cst_122 = arith.constant dense<0.000000e+00> : vector<9xf32>
    %213 = vector.multi_reduction <add>, %212, %cst_122 [1] : vector<9x32xf32> to vector<9xf32>
    %214 = vector.shape_cast %213 : vector<9xf32> to vector<9x1xf32>
    %cst_123 = arith.constant 3.200000e+01 : f32
    %215 = vector.broadcast %cst_123 : f32 to vector<9x1xf32>
    %216 = arith.divf %214, %215 : vector<9x1xf32>
    %217 = vector.broadcast %209 : vector<9x1xf32> to vector<9x32xf32>
    %218 = arith.subf %205, %217 : vector<9x32xf32>
    %cst_124 = arith.constant 9.99999997E-7 : f32
    %219 = vector.broadcast %cst_124 : f32 to vector<9x1xf32>
    %220 = arith.addf %216, %219 : vector<9x1xf32>
    %221 = math.rsqrt %220 : vector<9x1xf32>
    %222 = vector.broadcast %221 : vector<9x1xf32> to vector<9x32xf32>
    %223 = arith.mulf %218, %222 : vector<9x32xf32>
    %224 = vector.broadcast %12 : vector<1x32xf32> to vector<9x32xf32>
    %225 = arith.mulf %223, %224 : vector<9x32xf32>
    %226 = vector.broadcast %13 : vector<1x32xf32> to vector<9x32xf32>
    %227 = arith.addf %225, %226 : vector<9x32xf32>
    %228 = vector.shape_cast %227 : vector<9x32xf32> to vector<1x9x32xf32>
    %c0_125 = arith.constant 0 : index
    %c0_126 = arith.constant 0 : index
    %c0_127 = arith.constant 0 : index
    %229 = vector.load %arg18[%c0_125, %c0_126, %c0_127] : memref<1x9x32xf32, #tpu.memory_space<vmem>>, vector<1x9x32xf32>
    tpu.vector_store %arg18[%c0_125, %c0_126, %c0_127], %228 {strides = array<i32>} : memref<1x9x32xf32, #tpu.memory_space<vmem>>, vector<1x9x32xf32>,
    %c1_i32 = arith.constant 1 : i32
    %230 = arith.cmpi eq, %arg1, %c1_i32 : i32
    %231 = arith.extui %230 : i1 to i32
    %c0_i32_128 = arith.constant 0 : i32
    %232 = arith.cmpi ne, %231, %c0_i32_128 : i32
    scf.if %232 {
      %233 = arith.truncf %227 : vector<9x32xf32> to vector<9x32xbf16>
      %c0_129 = arith.constant 0 : index
      %c0_130 = arith.constant 0 : index
      %234 = vector.load %arg15[%c0_129, %c0_130] : memref<32x128xbf16, #tpu.memory_space<vmem>>, vector<32x128xbf16>
      %cst_131 = arith.constant dense<0.000000e+00> : vector<9x128xf32>
      %235 = tpu.matmul %233, %234, %cst_131 {dimension_numbers = #tpu.dot_dimension_numbers<[1], [0], [0], [1], [0, 0, 1, 1], [], []>} : vector<9x32xbf16>, vector<32x128xbf16>, vector<9x128xf32> -> vector<9x128xf32>
      %c0_132 = arith.constant 0 : index
      %c0_133 = arith.constant 0 : index
      %236 = vector.load %arg16[%c0_132, %c0_133] : memref<1x128xf32, #tpu.memory_space<vmem>>, vector<1x128xf32>
      %237 = vector.broadcast %236 : vector<1x128xf32> to vector<9x128xf32>
      %238 = arith.addf %235, %237 : vector<9x128xf32>
      %239 = vector.shape_cast %238 : vector<9x128xf32> to vector<1x9x128xf32>
      %c0_134 = arith.constant 0 : index
      %c0_135 = arith.constant 0 : index
      %c0_136 = arith.constant 0 : index
      %240 = vector.load %arg17[%c0_134, %c0_135, %c0_136] : memref<1x9x128xf32, #tpu.memory_space<vmem>>, vector<1x9x128xf32>
      tpu.vector_store %arg17[%c0_134, %c0_135, %c0_136], %239 {strides = array<i32>} : memref<1x9x128xf32, #tpu.memory_space<vmem>>, vector<1x9x128xf32>,
    } else {
    }
    return
  }
  func.func @transform_0(%arg0: i32, %arg1: i32) -> (i32, i32, i32) {
    %c0_i32 = arith.constant 0 : i32
    %c0_i32_0 = arith.constant 0 : i32
    %c0_i32_1 = arith.constant 0 : i32
    return %arg0, %c0_i32, %c0_i32_0 : i32, i32, i32
  }
  func.func @transform_1(%arg0: i32, %arg1: i32) -> (i32, i32, i32) {
    %c0_i32 = arith.constant 0 : i32
    %c0_i32_0 = arith.constant 0 : i32
    %c0_i32_1 = arith.constant 0 : i32
    return %arg0, %c0_i32, %c0_i32_0 : i32, i32, i32
  }
  func.func @transform_2(%arg0: i32, %arg1: i32) -> (i32, i32, i32) {
    %c0_i32 = arith.constant 0 : i32
    %c0_i32_0 = arith.constant 0 : i32
    %c0_i32_1 = arith.constant 0 : i32
    return %arg0, %c0_i32, %c0_i32_0 : i32, i32, i32
  }
  func.func @transform_3(%arg0: i32, %arg1: i32) -> (i32, i32) {
    %c0_i32 = arith.constant 0 : i32
    %c0_i32_0 = arith.constant 0 : i32
    %c0_i32_1 = arith.constant 0 : i32
    return %c0_i32, %c0_i32_0 : i32, i32
  }
  func.func @transform_4(%arg0: i32, %arg1: i32) -> (i32, i32) {
    %c0_i32 = arith.constant 0 : i32
    %c0_i32_0 = arith.constant 0 : i32
    %c0_i32_1 = arith.constant 0 : i32
    return %c0_i32, %c0_i32_0 : i32, i32
  }
  func.func @transform_5(%arg0: i32, %arg1: i32) -> (i32, i32) {
    %c0_i32 = arith.constant 0 : i32
    %c0_i32_0 = arith.constant 0 : i32
    %c0_i32_1 = arith.constant 0 : i32
    return %c0_i32, %c0_i32_0 : i32, i32
  }
  func.func @transform_6(%arg0: i32, %arg1: i32) -> (i32, i32, i32, i32) {
    %c0_i32 = arith.constant 0 : i32
    %c0_i32_0 = arith.constant 0 : i32
    %c0_i32_1 = arith.constant 0 : i32
    %c0_i32_2 = arith.constant 0 : i32
    return %arg1, %c0_i32, %c0_i32_0, %c0_i32_1 : i32, i32, i32, i32
  }
  func.func @transform_7(%arg0: i32, %arg1: i32) -> (i32, i32, i32, i32) {
    %c0_i32 = arith.constant 0 : i32
    %c0_i32_0 = arith.constant 0 : i32
    %c0_i32_1 = arith.constant 0 : i32
    %c0_i32_2 = arith.constant 0 : i32
    return %arg1, %c0_i32, %c0_i32_0, %c0_i32_1 : i32, i32, i32, i32
  }
  func.func @transform_8(%arg0: i32, %arg1: i32) -> (i32, i32, i32, i32) {
    %c0_i32 = arith.constant 0 : i32
    %c0_i32_0 = arith.constant 0 : i32
    %c0_i32_1 = arith.constant 0 : i32
    %c0_i32_2 = arith.constant 0 : i32
    return %arg1, %c0_i32, %c0_i32_0, %c0_i32_1 : i32, i32, i32, i32
  }
  func.func @transform_9(%arg0: i32, %arg1: i32) -> (i32, i32, i32, i32) {
    %c0_i32 = arith.constant 0 : i32
    %c0_i32_0 = arith.constant 0 : i32
    %c0_i32_1 = arith.constant 0 : i32
    %c0_i32_2 = arith.constant 0 : i32
    return %arg1, %c0_i32, %c0_i32_0, %c0_i32_1 : i32, i32, i32, i32
  }
  func.func @transform_10(%arg0: i32, %arg1: i32) -> (i32, i32, i32) {
    %c0_i32 = arith.constant 0 : i32
    %c0_i32_0 = arith.constant 0 : i32
    %c0_i32_1 = arith.constant 0 : i32
    return %arg1, %c0_i32, %c0_i32_0 : i32, i32, i32
  }
  func.func @transform_11(%arg0: i32, %arg1: i32) -> (i32, i32, i32) {
    %c0_i32 = arith.constant 0 : i32
    %c0_i32_0 = arith.constant 0 : i32
    %c0_i32_1 = arith.constant 0 : i32
    return %arg1, %c0_i32, %c0_i32_0 : i32, i32, i32
  }
  func.func @transform_12(%arg0: i32, %arg1: i32) -> (i32, i32, i32) {
    %c0_i32 = arith.constant 0 : i32
    %c0_i32_0 = arith.constant 0 : i32
    %c0_i32_1 = arith.constant 0 : i32
    return %arg1, %c0_i32, %c0_i32_0 : i32, i32, i32
  }
  func.func @transform_13(%arg0: i32, %arg1: i32) -> (i32, i32) {
    %c0_i32 = arith.constant 0 : i32
    %c0_i32_0 = arith.constant 0 : i32
    %c0_i32_1 = arith.constant 0 : i32
    return %c0_i32, %c0_i32_0 : i32, i32
  }
  func.func @transform_14(%arg0: i32, %arg1: i32) -> (i32, i32) {
    %c0_i32 = arith.constant 0 : i32
    %c0_i32_0 = arith.constant 0 : i32
    %c0_i32_1 = arith.constant 0 : i32
    return %c0_i32, %c0_i32_0 : i32, i32
  }
  func.func @transform_15(%arg0: i32, %arg1: i32) -> (i32, i32, i32) {
    %c0_i32 = arith.constant 0 : i32
    %c0_i32_0 = arith.constant 0 : i32
    %c0_i32_1 = arith.constant 0 : i32
    return %arg0, %c0_i32, %c0_i32_0 : i32, i32, i32
  }
}

</mosaic_0001>

<bundles_post_ra>
// kernel: tpu_custom_call.1
= control target key start
LH: loop header
LB: loop body
LE: loop exit
PB: predicated region body
PF: predicated region fallthrough
CT: control target
= control target key end

     0   :  { %s3297_s18 = smov 0   ;;  %s3299_s19 = smov 0   ;;  %s3696_s0 = inlined_call_operand.vmem [shape: f32[2,8,16], index: 0, kind: input, shape index: {}]   ;;  %s3697_s1 = inlined_call_operand.vmem [shape: f32[2,1,32], index: 1, kind: input, shape index: {}]   ;;  %s3698_s2 = inlined_call_operand.vmem [shape: f32[2,1,9], index: 2, kind: input, shape index: {}]   ;;  %s3699_s3 = inlined_call_operand.vmem [shape: f32[9,32], index: 3, kind: input, shape index: {}]   ;;  %s3700_s4 = inlined_call_operand.vmem [shape: bf16[16,32], index: 4, kind: input, shape index: {}]   ;;  %s3701_s5 = inlined_call_operand.vmem [shape: f32[1,32], index: 5, kind: input, shape index: {}]   ;;  %s3702_s6 = inlined_call_operand.vmem [shape: bf16[2,4,32,8], index: 6, kind: input, shape index: {}]   ;;  %s3703_s7 = inlined_call_operand.vmem [shape: bf16[2,4,32,8], index: 7, kind: input, shape index: {}]   ;;  %s3704_s8 = inlined_call_operand.vmem [shape: bf16[2,4,32,8], index: 8, kind: input, shape index: {}]   ;;  %s3705_s9 = inlined_call_operand.vmem [shape: bf16[2,4,8,32], index: 9, kind: input, shape index: {}]   ;;  %s3706_s10 = inlined_call_operand.vmem [shape: bf16[2,32,64], index: 10, kind: input, shape index: {}]   ;;  %s3707_s11 = inlined_call_operand.vmem [shape: bf16[2,64,32], index: 11, kind: input, shape index: {}]   ;;  %s3708_s12 = inlined_call_operand.vmem [shape: f32[2,8,64], index: 12, kind: input, shape index: {}]   ;;  %s3709_s13 = inlined_call_operand.vmem [shape: bf16[32,128], index: 13, kind: input, shape index: {}]   ;;  %s3710_s14 = inlined_call_operand.vmem [shape: f32[1,128], index: 14, kind: input, shape index: {}]   ;;  %s3711_s15 = inlined_call_operand.vmem [shape: f32[2,9,128], index: 15, kind: output, shape index: {}]  }
   0x1   :  { %3717 = sst [smem:[#allocation8_spill]] %s3696_s0  ;;  %s3301_s20 = smov 0  }
   0x2   :  { %3718 = sst [smem:[#allocation9_spill]] %s3697_s1  ;;  %s3303_s21 = smov 0  }
   0x3   :  { %3719 = sst [smem:[#allocation10_spill]] %s3699_s3  ;;  %s3305_s22 = smov 0  }
   0x4   :  { %3720 = sst [smem:[#allocation11_spill]] %s3700_s4 }
   0x5   :  { %3721 = sst [smem:[#allocation12_spill]] %s3701_s5 }
   0x6   :  { %3722 = sst [smem:[#allocation13_spill]] %s3702_s6 }
   0x7   :  { %3723 = sst [smem:[#allocation14_spill]] %s3703_s7 }
   0x8   :  { %3724 = sst [smem:[#allocation15_spill]] %s3704_s8 }
   0x9   :  { %3725 = sst [smem:[#allocation16_spill]] %s3709_s13 }
   0xa   :  { %3726 = sst [smem:[#allocation17_spill]] %s3710_s14 }
   0xb LB: > { %3727 = sst [smem:[#allocation3_spill]] %s3200_s20  ;;  %s34_s23 = sadd.s32 1, %s3200_s20  ;;  %s3208_s22 = sphi %s3305_s22, %s25_s22   ;;  %s3204_s21 = sphi %s3303_s21, %s3747_s21   ;;  %s3200_s20 = sphi %s3301_s20, %s3746_s20   ;;  %s3196_s19 = sphi %s3299_s19, %s3745_s19   ;;  %s3192_s18 = sphi %s3297_s18, %s3744_s18  }
   0xc   : > { %3728 = sst [smem:[#allocation4_spill]] %s3204_s21  ;;  %s37_s24 = sadd.s32 1, %s3204_s21 }
   0xd   : > { %3729 = sst [smem:[#allocation5_spill]] %s3208_s22  ;;  %p35_p0 = scmp.ge.s32.totalorder %s34_s23, 2 }
   0xe   : > { %p2644_p1 = scmp.ge.s32.totalorder %s3208_s22, 1  ;;  %p533_p2 = scmp.lt.s32.totalorder %s3208_s22, 5 }
   0xf   : > { %s3749_s23 = smov (%p35_p0, %s34_s23), 0  ;;  %s3751_s24 = smov (!%p35_p0, %s37_s24), %s3204_s21 }
  0x10   : > { %3730 = sst [smem:[#allocation6_spill]] %s3749_s23  ;;  %p534_p3 = pnand %p2644_p1, %p533_p2 }
  0x11   : > { %p39_p4 = scmp.ge.s32.totalorder %s3751_s24, 2  ;;  %p620_p5 = scmp.lt.s32.totalorder (!%p534_p3), %s3196_s19, 1 }
  0x12   : > { %537 = sbr.rel (%p534_p3) target bundleno = 5472 (0x1560), region = 80  ;;  %p630_p6 = scmp.lt.s32.totalorder (!%p534_p3), %s3192_s18, 1 }
  0x13   : > { %s3753_s24 = smov (%p39_p4, %s3751_s24), 0  ;;  %s3732_s1 = sld [smem:[#allocation9_spill]] (!%p534_p3) }
  0x14   : > { %3731 = sst [smem:[#allocation7_spill]] %s3753_s24  ;;  %s3733_s0 = sld [smem:[#allocation8_spill]] (!%p534_p3) }
  0x15   : > { %s3734_s6 = sld [smem:[#allocation13_spill]] (!%p534_p3)  ;;  %s3735_s7 = sld [smem:[#allocation14_spill]] (!%p534_p3) }
  0x16   : > { %s3736_s8 = sld [smem:[#allocation15_spill]] (!%p534_p3)  ;;  %p2661_p7 = scmp.ne.s32.totalorder (!%p534_p3), %s3192_s18, 0 }
  0x19   : > { %s3755_s19 = smov (!%p620_p5, %s3196_s19), 1  ;;  %v3210_v1 = vmov (!%p2661_p7), 0.0   ;;  %vm3211_vm0 = vmmov (!%p2661_p7), 0   ;;  %vm691_vm1 = vcmask (!%p2661_p7), 130048   ;;  %vm739_vm2 = vcmask (!%p2661_p7), 253952  }
  0x1a   : > { %s631_s25 = scalar_select %p630_p6, %s3192_s18, 1 }
  0x1b   : > { %s2645_s26 = sshll.u32 %s3755_s19, 3  ;;  %s626_s29 = scalar_lea.vmem %s3732_s1, %s3755_s19  ;;  %2848 = vmatprep.subr.bf16.mxu0 (!%p2661_p7), %v3210_v1  ;;  %2850 = vmatprep.mubr.msk.bf16.mxu0 (!%p2661_p7), %vm3211_vm0, %v3210_v1  ;;  %vm743_vm3 = vcmask (!%p2661_p7), 1046528   ;;  %vm749_vm4 = vcmask (!%p2661_p7), 261120  }
  0x1c   : > { %s623_s17 = scalar_lea.vmem %s3733_s0, %s2645_s26  ;;  %s2768_s20 = sshll.u32 %s631_s25, 6  ;;  %v737_v5 = vld [vmem:[%s626_s29] sm:$0x1] (!%p2661_p7) }
  0x1d   : > { %s2771_s22 = sshll.u32 %s631_s25, 4  ;;  %s3348_s5 = scalar_lea.vmem %s3734_s6, %s2768_s20  ;;  %v674_v2 = vld [vmem:[%s623_s17] sm:$0xff] (!%p2661_p7) }
  0x1e   : > { %s3353_s27 = scalar_lea.vmem %s3735_s7, %s2768_s20  ;;  %s3358_s26 = scalar_lea.vmem %s3736_s8, %s2768_s20  ;;  %v675_v3 = vpack.c.bf16 (!%p2661_p7), %v674_v2, %v674_v2 }
  0x1f   : > { %s3363_s24 = scalar_lea.vmem %s3705_s9, %s2771_s22  ;;  %s3368_s13 = scalar_lea.vmem %s3706_s10, %s2771_s22 }
  0x20   : > { %s2773_s14 = sshll.u32 %s631_s25, 5  ;;  %s2658_s6 = sshll.u32 %s631_s25, 3 }
  0x21   : > { %s3373_s4 = scalar_lea.vmem %s3707_s11, %s2773_s14  ;;  %s3378_s28 = scalar_lea.vmem %s3708_s12, %s2658_s6 }
  0x22   : > { %s2774_s30 = sshll.u32 %s3755_s19, 4  ;;  %673 = sbr.rel (%p2661_p7) target bundleno = 262 (0x106), region = 84 }
  0x23   : > { %s3384_s8 = scalar_lea.vmem %s3711_s15, %s2774_s30  ;;  %s3737_s0 = sld [smem:[#allocation11_spill]] (!%p2661_p7) }
  0x24   : > { %s3738_s25 = sld [smem:[#allocation10_spill]] (!%p2661_p7)  ;;  %s3739_s1 = sld [smem:[#allocation12_spill]] (!%p2661_p7) }
  0x29   : > { %v3097_v0 = vld [vmem:[%s3737_s0] sm:$0xff]  }
  0x2a   : > { %2849 = vmatpush3.bf16.msra.mxu0 %v3097_v0  ;;  %v735_v4 = vld [vmem:[%s3738_s25] sm:$0xff]  ;;  %v736_v7 = vld [vmem:[%s3738_s25 + $0x8] sm:$0x1] }
  0x2b   : > { %v738_v6 = vadd.f32 %v737_v5, %v735_v4  ;;  %v744_v8 = vrot.slane %v735_v4, 1  ;;  %v745_v9 = vrot.slane %v736_v7, 1  ;;  %v2662_v10 = vld [vmem:[%s3739_s1] ss:$0 sm:$0xff] }
  0x2d   : > { %2851 = vmatmul.mubr.msk.bf16.vlgmr.msra.gmra.mrb[0].mxu0 %vm691_vm1, %v675_v3  ;;  %740 = vst.msk [vmem:[#allocation2] sm:$0x1] %vm739_vm2, %v738_v6  ;;  %v746_v12 = vsel %vm743_vm3, %v744_v8, %v745_v9 }
 0x100   : > { %v729_v11 = vpop.f32.mrb[0].mxu0 }
 0x101   : > { %v730_v13 = vadd.f32 %v2662_v10, %v729_v11  ;;  %v2852_v14 = vpop.f32.mrb[1].mxu0 }
 0x102   : > { %v732_v15 = vpop.f32.mrb[2].mxu0 }
 0x103   : > { %v748_v16 = vadd.f32 %v746_v12, %v730_v13  ;;  %v2853_v17 = vpop.f32.mrb[3].mxu0 }
 0x105   : > { %750 = vst.msk [vmem:[#allocation2 + $0x1] sm:$0xff] %vm749_vm4, %v748_v16 }
 0x106 PF: > { %v3098_v18 = vld [vmem:[%s3353_s27] sm:$0xff]   ;;  %v3212_v19 = vmov 0.0   ;;  %v3099_v20 = vld [vmem:[%s3353_s27 + $0x8] sm:$0xff]   ;;  %vm3213_vm5 = vmmov 0   ;;  %vm772_vm6 = vcmask 261120   ;;  %vm934_vm7 = vcmask 64512   ;;  %s3740_s30 = scalar_lea.vmem %s3698_s2, %s3755_s19 }
 0x107   : > { %2862 = vmatprep.subr.bf16.mxu1 %v3212_v19  ;;  %2854 = vmatprep.subr.bf16.mxu0 %v3212_v19  ;;  %v3100_v21 = vld [vmem:[%s3348_s5] sm:$0xff]   ;;  %v3101_v24 = vld [vmem:[%s3348_s5 + $0x8] sm:$0xff]   ;;  %vm992_vm8 = vcmask 72704   ;;  %vm996_vm9 = vcmask 65536   ;;  %vm1020_vm10 = vcmask 1043456   ;;  %vm1021_vm11 = vcmask 1044480  }
 0x108   : > { %2863 = vmatpush3.bf16.msra.mxu1 %v3098_v18  ;;  %2866 = vmatprep.mubr.msk.bf16.mxu1 %vm3213_vm5, %v3212_v19  ;;  %v3102_v37 = vld [vmem:[%s3358_s26] sm:$0xff]   ;;  %v3103_v38 = vld [vmem:[%s3358_s26 + $0x8] sm:$0xff]   ;;  %v3214_v1 = vmov 65535   ;;  %v3106_v5 = vld [vmem:[%s3348_s5 + $0x10] sm:$0xff]   ;;  %vm2170_vm12 = vcmask 253952   ;;  %vm2311_vm13 = vcmask 523264  }
 0x109   : > { %2864 = vmatprep.subr.bf16.mxu1 %v3212_v19  ;;  %2858 = vmatprep.mubr.msk.bf16.mxu0 %vm3213_vm5, %v3212_v19  ;;  %v3447_v40 = vld [vmem:[%s3740_s30] ss:$0 sm:$0xff]  ;;  %v1022_v2 = vsel %vm1020_vm10, 4294967295, %v3214_v1  ;;  %v3107_v6 = vld [vmem:[%s3348_s5 + $0x18] sm:$0xff]   ;;  %v3104_v13 = vld [vmem:[%s3353_s27 + $0x10] sm:$0xff]   ;;  %p2761_p8 = scmp.ne.s32.totalorder %s3192_s18, 1 }
 0x10a   : > { %2855 = vmatpush3.bf16.msra.mxu0 %v3100_v21  ;;  %v3456_v3 = vsel %vm1021_vm11, %v1022_v2, 0  ;;  %v3105_v15 = vld [vmem:[%s3353_s27 + $0x18] sm:$0xff]   ;;  %v2700_v1 = vld [vmem:[%s3363_s24 + $0x4] sm:$0xf]  ;;  %vm3216_vm14 = vmmov (!%p2761_p8), 0  }
 0x10b   : > { %2856 = vmatprep.subr.bf16.mxu0 %v3212_v19  ;;  %v1375_v2 = vsel %vm1020_vm10, %v2700_v1, 0 }
 0x10c   : > { %v3407_v22 = vld [vmem:[#allocation2] sm:$0xff]  ;;  %v3409_v23 = vld [vmem:[#allocation2 + $0x8] sm:$0x1]  ;;  %2865 = vmatpush3.bf16.msra.mxu1 %v3099_v20 }
 0x10d   : > { %v3416_v25 = vpack.c.bf16 %v3409_v23, %v3407_v22  ;;  %2878 = vmatprep.subr.bf16.mxu1 %v3212_v19 }
 0x10e   : > { %2857 = vmatpush3.bf16.msra.mxu0 %v3101_v24 }
 0x10f   : > { %2867 = vmatmul.mubr.msk.bf16.vlgmr.msra.gmra.mrb[0].mxu1 %vm772_vm6, %v3416_v25  ;;  %2870 = vmatprep.subr.bf16.mxu0 %v3212_v19 }
 0x110   : > { %2880 = vmatprep.mubr.msk.bf16.mxu1 %vm3213_vm5, %v3212_v19 }
 0x111   : > { %2859 = vmatmul.mubr.msk.bf16.vlgmr.msra.gmra.mrb[0].mxu0 %vm772_vm6, %v3416_v25 }
 0x112   : > { %2874 = vmatprep.mubr.msk.bf16.mxu0 %vm3213_vm5, %v3212_v19  ;;  %2871 = vmatpush3.bf16.msra.mxu0 %v3102_v37  ;;  %v3109_v37 = vld [vmem:[%s3358_s26 + $0x18] sm:$0xff]  }
 0x113   : > { %2872 = vmatprep.subr.bf16.mxu0 %v3212_v19 }
 0x116   : > { %2873 = vmatpush3.bf16.msra.mxu0 %v3103_v38 }
 0x117   : > { %2884 = vmatprep.subr.bf16.mxu0 %v3212_v19 }
 0x119   : > { %2875 = vmatmul.mubr.msk.bf16.vlgmr.msra.gmra.mrb[4].mxu0 %vm772_vm6, %v3416_v25 }
 0x11a   : > { %2886 = vmatprep.mubr.msk.bf16.mxu0 %vm3213_vm5, %v3212_v19 }
 0x1e2   : > { %v867_v26 = vpop.f32.mrb[0].mxu1 }
 0x1e3   : > { %v2868_v27 = vpop.f32.mrb[1].mxu1 }
 0x1e4   : > { %v870_v28 = vpop.f32.mrb[2].mxu1  ;;  %v810_v29 = vpop.f32.mrb[0].mxu0 }
 0x1e5   : > { %v932_v30 = vpack.c.bf16 %v870_v28, %v867_v26  ;;  %v2869_v31 = vpop.f32.mrb[3].mxu1  ;;  %v2860_v32 = vpop.f32.mrb[1].mxu0 }
 0x1e6   : > { %v813_v33 = vpop.f32.mrb[2].mxu0 }
 0x1e7   : > { %v939_v34 = vsel %vm934_vm7, %v932_v30, 0  ;;  %v931_v35 = vpack.c.bf16 %v813_v33, %v810_v29  ;;  %v2861_v36 = vpop.f32.mrb[3].mxu0 }
 0x1e8   : > { %2879 = vmatpush3.bf16.xpose.msra.mxu1 %v939_v34  ;;  %v3108_v36 = vld [vmem:[%s3358_s26 + $0x10] sm:$0xff]  }
 0x1e9   : > { %2890 = vmatprep.subr.bf16.mxu1 %v3212_v19 }
 0x1ec   : > { %v924_v60 = vpop.f32.mrb[4].mxu0 }
 0x1ed   : > { %v2876_v61 = vpop.f32.mrb[5].mxu0 }
 0x1ee   : > { %v927_v62 = vpop.f32.mrb[6].mxu0 }
 0x1ef   : > { %2881 = vmatmul.mubr.msk.bf16.vlgmr.msra.gmra.mrb[4].mxu1 %vm934_vm7, %v931_v35  ;;  %v2877_v63 = vpop.f32.mrb[7].mxu0  ;;  %v933_v0 = vpack.c.bf16 %v927_v62, %v924_v60 }
 0x1f0   : > { %2894 = vmatprep.mubr.msk.bf16.mxu1 %vm3213_vm5, %v3212_v19  ;;  %2891 = vmatpush3.bf16.msra.mxu1 %v3106_v5 }
 0x1f1   : > { %v1025_v4 = vand.u32 %v3456_v3, %v933_v0  ;;  %2892 = vmatprep.subr.bf16.mxu1 %v3212_v19 }
 0x1f3   : > { %2885 = vmatpush3.bf16.msra.mxu0 %v1025_v4 }
 0x1f4   : > { %2898 = vmatprep.subr.bf16.mxu0 %v3212_v19  ;;  %2893 = vmatpush3.bf16.msra.mxu1 %v3107_v6 }
 0x1f5   : > { %2906 = vmatprep.subr.bf16.mxu1 %v3212_v19 }
 0x1f7   : > { %2895 = vmatmul.mubr.msk.bf16.vlgmr.msra.gmra.mrb[8].mxu1 %vm772_vm6, %v3416_v25 }
 0x1f8   : > { %2910 = vmatprep.mubr.msk.bf16.mxu1 %vm3213_vm5, %v3212_v19  ;;  %2907 = vmatpush3.bf16.msra.mxu1 %v3108_v36 }
 0x1f9   : > { %2908 = vmatprep.subr.bf16.mxu1 %v3212_v19 }
 0x1fc   : > { %2909 = vmatpush3.bf16.msra.mxu1 %v3109_v37 }
 0x1fd   : > { %2920 = vmatprep.subr.bf16.mxu1 %v3212_v19 }
 0x1ff   : > { %2911 = vmatmul.mubr.msk.bf16.vlgmr.msra.gmra.mrb[12].mxu1 %vm772_vm6, %v3416_v25 }
 0x200   : > { %2922 = vmatprep.mubr.msk.bf16.mxu1 %vm3213_vm5, %v3212_v19 }
 0x2c2   : > { %v975_v39 = vpop.f32.mrb[4].mxu1 }
 0x2c3   : > { %v982_v41 = vmul.f32 0.35355338, %v975_v39  ;;  %v2882_v42 = vpop.f32.mrb[5].mxu1 }
 0x2c4   : > { %v978_v43 = vpop.f32.mrb[6].mxu1 }
 0x2c5   : > { %v983_v44 = vmul.f32 0.35355338, %v978_v43  ;;  %v2883_v45 = vpop.f32.mrb[7].mxu1  ;;  %v990_v46 = vadd.f32 %v3447_v40, %v982_v41 }
 0x2c7   : > { %v993_v47 = vsel %vm992_vm8, %v990_v46, -inf  ;;  %v991_v48 = vadd.f32 %v3447_v40, %v983_v44 }
 0x2c8   : > { %994 = vmax.xlane.f32.xlu0 %v993_v47 }
 0x2c9   : > { %v997_v49 = vsel %vm996_vm9, %v991_v48, -inf }
 0x2ca   : > { %v1121_v16 = vpop.f32.mrb[8].mxu1 }
 0x2cb   : > { %v2896_v17 = vpop.f32.mrb[9].mxu1 }
 0x2cc   : > { %998 = vmax.xlane.f32.xlu0 %v997_v49  ;;  %v1124_v18 = vpop.f32.mrb[10].mxu1 }
 0x2cd   : > { %v1244_v20 = vpack.c.bf16 %v1124_v18, %v1121_v16  ;;  %v2897_v21 = vpop.f32.mrb[11].mxu1  ;;  %v3112_v18 = vld [vmem:[%s3348_s5 + $0x20] sm:$0xff]  }
 0x355   : > { %v995_v50 = vpop.xlane.xlu0 %994 }
 0x356   : > { %v1000_v51 = vsub.f32 %v990_v46, %v995_v50 }
 0x358   : > { %v1002_v52 = vmul.f32 1.442695, %v1000_v51 }
 0x359   : > { %v999_v53 = vpop.xlane.xlu0 %998 }
 0x35a   : > { %3128 = vpow2.f32 %v1002_v52  ;;  %v1001_v54 = vsub.f32 %v991_v48, %v999_v53 }
 0x35c   : > { %v1004_v55 = vmul.f32 1.442695, %v1001_v54 }
 0x35e   : > { %3130 = vpow2.f32 %v1004_v55 }
 0x364   : > { %v3129_v56 = vpop.eup %3128 }
 0x365   : > { %v1006_v57 = vsel %vm992_vm8, %v3129_v56, 0.0 }
 0x366   : > { %1007 = vadd.xlane.f32.xlu1 %v1006_v57 }
 0x368   : > { %v3131_v58 = vpop.eup %3130 }
 0x369   : > { %v1009_v59 = vsel %vm996_vm9, %v3131_v58, 0.0 }
 0x36a   : > { %1010 = vadd.xlane.f32.xlu1 %v1009_v59  ;;  %v1237_v59 = vpop.f32.mrb[12].mxu1 }
 0x36b   : > { %v2912_v60 = vpop.f32.mrb[13].mxu1 }
 0x36c   : > { %v1240_v61 = vpop.f32.mrb[14].mxu1 }
 0x36d   : > { %v2913_v62 = vpop.f32.mrb[15].mxu1  ;;  %v1246_v63 = vpack.c.bf16 %v1240_v61, %v1237_v59 }
 0x36f   : > { %v1325_v0 = vand.u32 %v1246_v63, %v3456_v3 }
 0x371   : > { %2921 = vmatpush3.bf16.msra.mxu1 %v1325_v0 }
 0x372   : > { %2932 = vmatprep.subr.bf16.mxu1 %v3212_v19 }
 0x3f3   : > { %v1008_v7 = vpop.xlane.xlu1 %1007 }
 0x3f4   : > { %3132 = vrcp.f32 %v1008_v7 }
 0x3f7   : > { %v1011_v8 = vpop.xlane.xlu1 %1010 }
 0x3f8   : > { %3134 = vrcp.f32 %v1011_v8  ;;  %v1069_v8 = vld [vmem:[%s3363_s24] sm:$0xf] }
 0x3fe   : > { %v3133_v9 = vpop.eup %3132 }
 0x3ff   : > { %v1014_v11 = vmul.f32 %v3133_v9, %v3129_v56 }
 0x402   : > { %v3135_v10 = vpop.eup %3134 }
 0x403   : > { %v1015_v12 = vmul.f32 %v3135_v10, %v3131_v58 }
 0x405   : > { %v1016_v14 = vpack.c.bf16 %v1015_v12, %v1014_v11  ;;  %v1422_v12 = vsel %vm1020_vm10, %v1069_v8, 0 }
 0x407   : > { %2887 = vmatmul.mubr.msk.bf16.vlgmr.msra.gmra.mrb[8].mxu0 %vm992_vm8, %v1016_v14  ;;  %v3111_v14 = vld [vmem:[%s3353_s27 + $0x28] sm:$0xff]  }
 0x408   : > { %2899 = vmatpush3.bf16.msra.mxu0 %v3104_v13  ;;  %2902 = vmatprep.mubr.msk.bf16.mxu0 %vm3213_vm5, %v3212_v19  ;;  %v3110_v13 = vld [vmem:[%s3353_s27 + $0x20] sm:$0xff]  }
 0x409   : > { %2900 = vmatprep.subr.bf16.mxu0 %v3212_v19 }
 0x40c   : > { %2901 = vmatpush3.bf16.msra.mxu0 %v3105_v15 }
 0x40d   : > { %2914 = vmatprep.subr.bf16.mxu0 %v3212_v19 }
 0x40f   : > { %2903 = vmatmul.mubr.msk.bf16.vlgmr.msra.gmra.mrb[12].mxu0 %vm772_vm6, %v3416_v25 }
 0x410   : > { %2916 = vmatprep.mubr.msk.bf16.mxu0 %vm3213_vm5, %v3212_v19 }
 0x4da   : > { %v3479_v24 = vpop.f32.mrb[8].mxu0 }
 0x4db   : > { %v2888_v26 = vpop.f32.mrb[9].mxu0 }
 0x4dc   : > { %v3481_v27 = vpop.f32.mrb[10].mxu0 }
 0x4dd   : > { %v1068_v28 = vpack.c.bf16 %v3481_v27, %v3479_v24  ;;  %v2889_v29 = vpop.f32.mrb[11].mxu0  ;;  %v3113_v24 = vld [vmem:[%s3348_s5 + $0x28] sm:$0xff]  }
 0x4e2   : > { %v1179_v30 = vpop.f32.mrb[12].mxu0 }
 0x4e3   : > { %v2904_v31 = vpop.f32.mrb[13].mxu0 }
 0x4e4   : > { %v1182_v32 = vpop.f32.mrb[14].mxu0 }
 0x4e5   : > { %v1245_v33 = vpack.c.bf16 %v1182_v32, %v1179_v30  ;;  %v2905_v34 = vpop.f32.mrb[15].mxu0 }
 0x4e7   : > { %v1251_v35 = vsel %vm934_vm7, %v1245_v33, 0 }
 0x4e8   : > { %2915 = vmatpush3.bf16.xpose.msra.mxu0 %v1251_v35 }
 0x4e9   : > { %2926 = vmatprep.subr.bf16.mxu0 %v3212_v19 }
 0x4ef   : > { %2917 = vmatmul.mubr.msk.bf16.vlgmr.msra.gmra.mrb[16].mxu0 %vm934_vm7, %v1244_v20 }
 0x4f0   : > { %2928 = vmatprep.mubr.msk.bf16.mxu0 %vm3213_vm5, %v3212_v19  ;;  %2927 = vmatpush3.bf16.msra.mxu0 %v1375_v2 }
 0x4f1   : > { %2938 = vmatprep.subr.bf16.mxu0 %v3212_v19 }
 0x5c2   : > { %v1287_v38 = vpop.f32.mrb[16].mxu0 }
 0x5c3   : > { %v1294_v39 = vmul.f32 0.35355338, %v1287_v38  ;;  %v2918_v41 = vpop.f32.mrb[17].mxu0 }
 0x5c4   : > { %v1290_v42 = vpop.f32.mrb[18].mxu0 }
 0x5c5   : > { %v1295_v43 = vmul.f32 0.35355338, %v1290_v42  ;;  %v2919_v44 = vpop.f32.mrb[19].mxu0  ;;  %v1296_v45 = vadd.f32 %v3447_v40, %v1294_v39 }
 0x5c7   : > { %v1298_v46 = vsel %vm992_vm8, %v1296_v45, -inf  ;;  %v1297_v47 = vadd.f32 %v3447_v40, %v1295_v43 }
 0x5c8   : > { %1299 = vmax.xlane.f32.xlu0 %v1298_v46 }
 0x5c9   : > { %v1301_v48 = vsel %vm996_vm9, %v1297_v47, -inf }
 0x5ca   : > { %1302 = vmax.xlane.f32.xlu1 %v1301_v48  ;;  %v3114_v48 = vld [vmem:[%s3358_s26 + $0x20] sm:$0xff]  }
 0x655   : > { %v1300_v49 = vpop.xlane.xlu0 %1299 }
 0x656   : > { %v1304_v50 = vsub.f32 %v1296_v45, %v1300_v49  ;;  %v3115_v49 = vld [vmem:[%s3358_s26 + $0x28] sm:$0xff]  }
 0x657   : > { %v1303_v51 = vpop.xlane.xlu1 %1302 }
 0x658   : > { %v1306_v52 = vmul.f32 1.442695, %v1304_v50  ;;  %v1305_v53 = vsub.f32 %v1297_v47, %v1303_v51 }
 0x65a   : > { %3136 = vpow2.f32 %v1306_v52  ;;  %v1308_v54 = vmul.f32 1.442695, %v1305_v53 }
 0x65c   : > { %3138 = vpow2.f32 %v1308_v54 }
 0x664   : > { %v3137_v55 = vpop.eup %3136 }
 0x665   : > { %v1310_v56 = vsel %vm992_vm8, %v3137_v55, 0.0 }
 0x666   : > { %v3139_v57 = vpop.eup %3138  ;;  %1311 = vadd.xlane.f32.xlu0 %v1310_v56 }
 0x667   : > { %v1313_v58 = vsel %vm996_vm9, %v3139_v57, 0.0 }
 0x668   : > { %1314 = vadd.xlane.f32.xlu1 %v1313_v58 }
 0x6f3   : > { %v1312_v4 = vpop.xlane.xlu0 %1311 }
 0x6f4   : > { %3140 = vrcp.f32 %v1312_v4 }
 0x6f5   : > { %v1315_v5 = vpop.xlane.xlu1 %1314 }
 0x6f6   : > { %3142 = vrcp.f32 %v1315_v5 }
 0x6fe   : > { %v3141_v6 = vpop.eup %3140 }
 0x6ff   : > { %v1318_v9 = vmul.f32 %v3141_v6, %v3137_v55 }
 0x700   : > { %v3143_v7 = vpop.eup %3142 }
 0x701   : > { %v1319_v10 = vmul.f32 %v3143_v7, %v3139_v57 }
 0x703   : > { %v1320_v11 = vpack.c.bf16 %v1319_v10, %v1318_v9 }
 0x705   : > { %2923 = vmatmul.mubr.msk.bf16.vlgmr.msra.gmra.mrb[16].mxu1 %vm992_vm8, %v1320_v11 }
 0x706   : > { %2933 = vmatpush3.bf16.msra.mxu1 %v1422_v12  ;;  %2934 = vmatprep.mubr.msk.bf16.mxu1 %vm3213_vm5, %v3212_v19 }
 0x707   : > { %2946 = vmatprep.subr.bf16.mxu1 %v3212_v19 }
 0x70d   : > { %2935 = vmatmul.mubr.msk.bf16.vlgmr.msra.gmra.mrb[20].mxu1 %vm934_vm7, %v1068_v28 }
 0x70e   : > { %2947 = vmatpush3.bf16.msra.mxu1 %v3110_v13  ;;  %2950 = vmatprep.mubr.msk.bf16.mxu1 %vm3213_vm5, %v3212_v19  ;;  %v2726_v13 = vld [vmem:[%s3363_s24 + $0x8] sm:$0xf] }
 0x70f   : > { %2948 = vmatprep.subr.bf16.mxu1 %v3212_v19 }
 0x712   : > { %2949 = vmatpush3.bf16.msra.mxu1 %v3111_v14  ;;  %v1770_v14 = vsel %vm1020_vm10, %v2726_v13, 0 }
 0x713   : > { %2962 = vmatprep.subr.bf16.mxu1 %v3212_v19 }
 0x715   : > { %2951 = vmatmul.mubr.msk.bf16.vlgmr.msra.gmra.mrb[24].mxu1 %vm772_vm6, %v3416_v25 }
 0x716   : > { %2964 = vmatprep.mubr.msk.bf16.mxu1 %vm3213_vm5, %v3212_v19 }
 0x7d8   : > { %v1361_v15 = vpop.f32.mrb[16].mxu1 }
 0x7d9   : > { %v2924_v16 = vpop.f32.mrb[17].mxu1 }
 0x7da   : > { %v1364_v17 = vpop.f32.mrb[18].mxu1 }
 0x7db   : > { %v1368_v20 = vpack.c.bf16 %v1364_v17, %v1361_v15  ;;  %v2925_v21 = vpop.f32.mrb[19].mxu1 }
 0x7dd   : > { %2929 = vmatmul.mubr.msk.bf16.vlgmr.msra.gmra.mrb[20].mxu0 %vm934_vm7, %v1368_v20 }
 0x7de   : > { %2939 = vmatpush3.bf16.msra.mxu0 %v3112_v18  ;;  %2942 = vmatprep.mubr.msk.bf16.mxu0 %vm3213_vm5, %v3212_v19 }
 0x7df   : > { %2940 = vmatprep.subr.bf16.mxu0 %v3212_v19 }
 0x7e0   : > { %v1458_v26 = vpop.f32.mrb[20].mxu1 }
 0x7e1   : > { %v2936_v27 = vpop.f32.mrb[21].mxu1 }
 0x7e2   : > { %v1461_v28 = vpop.f32.mrb[22].mxu1  ;;  %2941 = vmatpush3.bf16.msra.mxu0 %v3113_v24  ;;  %v3119_v27 = vld [vmem:[%s3348_s5 + $0x38] sm:$0xff]  }
 0x7e3   : > { %v2937_v29 = vpop.f32.mrb[23].mxu1  ;;  %2954 = vmatprep.subr.bf16.mxu0 %v3212_v19 }
 0x7e5   : > { %2943 = vmatmul.mubr.msk.bf16.vlgmr.msra.gmra.mrb[24].mxu0 %vm772_vm6, %v3416_v25 }
 0x7e6   : > { %2958 = vmatprep.mubr.msk.bf16.mxu0 %vm3213_vm5, %v3212_v19  ;;  %2955 = vmatpush3.bf16.msra.mxu0 %v3114_v48 }
 0x7e7   : > { %2956 = vmatprep.subr.bf16.mxu0 %v3212_v19 }
 0x7e8   : > { %v1574_v30 = vpop.f32.mrb[24].mxu1 }
 0x7e9   : > { %v2952_v31 = vpop.f32.mrb[25].mxu1 }
 0x7ea   : > { %v1577_v32 = vpop.f32.mrb[26].mxu1  ;;  %2957 = vmatpush3.bf16.msra.mxu0 %v3115_v49  ;;  %v3116_v31 = vld [vmem:[%s3353_s27 + $0x30] sm:$0xff]  }
 0x7eb   : > { %v1640_v33 = vpack.c.bf16 %v1577_v32, %v1574_v30  ;;  %v2953_v34 = vpop.f32.mrb[27].mxu1  ;;  %2968 = vmatprep.subr.bf16.mxu0 %v3212_v19 }
 0x7ec   : > { %v3117_v34 = vld [vmem:[%s3353_s27 + $0x38] sm:$0xff]   ;;  %s3741_s27 = sld [smem:[#allocation16_spill]] (!%p2761_p8) }
 0x7ed   : > { %v1646_v35 = vsel %vm934_vm7, %v1640_v33, 0  ;;  %2959 = vmatmul.mubr.msk.bf16.vlgmr.msra.gmra.mrb[28].mxu0 %vm772_vm6, %v3416_v25 }
 0x7ee   : > { %2963 = vmatpush3.bf16.xpose.msra.mxu1 %v1646_v35  ;;  %2970 = vmatprep.mubr.msk.bf16.mxu0 %vm3213_vm5, %v3212_v19 }
 0x7ef   : > { %2974 = vmatprep.subr.bf16.mxu1 %v3212_v19 }
 0x8b0   : > { %v1411_v36 = vpop.f32.mrb[20].mxu0 }
 0x8b1   : > { %v3542_v37 = vadd.f32 %v1458_v26, %v1411_v36  ;;  %v2930_v38 = vpop.f32.mrb[21].mxu0  ;;  %v3118_v26 = vld [vmem:[%s3348_s5 + $0x30] sm:$0xff]  }
 0x8b2   : > { %v1414_v39 = vpop.f32.mrb[22].mxu0 }
 0x8b3   : > { %v3544_v41 = vadd.f32 %v1461_v28, %v1414_v39  ;;  %v2931_v42 = vpop.f32.mrb[23].mxu0 }
 0x8b8   : > { %v1516_v43 = vpop.f32.mrb[24].mxu0 }
 0x8b9   : > { %v2944_v44 = vpop.f32.mrb[25].mxu0 }
 0x8ba   : > { %v1519_v45 = vpop.f32.mrb[26].mxu0 }
 0x8bb   : > { %v1639_v46 = vpack.c.bf16 %v1519_v45, %v1516_v43  ;;  %v2945_v47 = vpop.f32.mrb[27].mxu0 }
 0x8bd   : > { %2965 = vmatmul.mubr.msk.bf16.vlgmr.msra.gmra.mrb[28].mxu1 %vm934_vm7, %v1639_v46 }
 0x8be   : > { %2976 = vmatprep.mubr.msk.bf16.mxu1 %vm3213_vm5, %v3212_v19  ;;  %2975 = vmatpush3.bf16.msra.mxu1 %v1770_v14 }
 0x8bf   : > { %2988 = vmatprep.subr.bf16.mxu1 %v3212_v19 }
 0x8c0   : > { %v1632_v7 = vpop.f32.mrb[28].mxu0 }
 0x8c1   : > { %v2960_v8 = vpop.f32.mrb[29].mxu0 }
 0x8c2   : > { %v1635_v9 = vpop.f32.mrb[30].mxu0 }
 0x8c3   : > { %v2961_v10 = vpop.f32.mrb[31].mxu0  ;;  %v1641_v11 = vpack.c.bf16 %v1635_v9, %v1632_v7 }
 0x8c5   : > { %v1720_v12 = vand.u32 %v1641_v11, %v3456_v3 }
 0x8c7   : > { %2969 = vmatpush3.bf16.msra.mxu0 %v1720_v12 }
 0x8c8   : > { %2980 = vmatprep.subr.bf16.mxu0 %v3212_v19 }
 0x990   : > { %v1682_v50 = vpop.f32.mrb[28].mxu1 }
 0x991   : > { %v1689_v51 = vmul.f32 0.35355338, %v1682_v50  ;;  %v2966_v52 = vpop.f32.mrb[29].mxu1 }
 0x992   : > { %v1685_v53 = vpop.f32.mrb[30].mxu1 }
 0x993   : > { %v1690_v54 = vmul.f32 0.35355338, %v1685_v53  ;;  %v2967_v55 = vpop.f32.mrb[31].mxu1  ;;  %v1691_v56 = vadd.f32 %v3447_v40, %v1689_v51 }
 0x995   : > { %v1693_v57 = vsel %vm992_vm8, %v1691_v56, -inf  ;;  %v1692_v58 = vadd.f32 %v3447_v40, %v1690_v54 }
 0x996   : > { %1694 = vmax.xlane.f32.xlu0 %v1693_v57 }
 0x997   : > { %v1696_v59 = vsel %vm996_vm9, %v1692_v58, -inf }
 0x998   : > { %1697 = vmax.xlane.f32.xlu1 %v1696_v59 }
 0xa23   : > { %v1695_v60 = vpop.xlane.xlu0 %1694 }
 0xa24   : > { %v1699_v61 = vsub.f32 %v1691_v56, %v1695_v60 }
 0xa25   : > { %v1698_v62 = vpop.xlane.xlu1 %1697 }
 0xa26   : > { %v1701_v63 = vmul.f32 1.442695, %v1699_v61  ;;  %v1700_v0 = vsub.f32 %v1692_v58, %v1698_v62 }
 0xa28   : > { %3144 = vpow2.f32 %v1701_v63  ;;  %v1703_v1 = vmul.f32 1.442695, %v1700_v0 }
 0xa2a   : > { %3146 = vpow2.f32 %v1703_v1 }
 0xa32   : > { %v3145_v2 = vpop.eup %3144 }
 0xa33   : > { %v1705_v4 = vsel %vm992_vm8, %v3145_v2, 0.0 }
 0xa34   : > { %v3147_v5 = vpop.eup %3146  ;;  %1706 = vadd.xlane.f32.xlu0 %v1705_v4 }
 0xa35   : > { %v1708_v6 = vsel %vm996_vm9, %v3147_v5, 0.0 }
 0xa36   : > { %1709 = vadd.xlane.f32.xlu1 %v1708_v6 }
 0xac1   : > { %v1707_v15 = vpop.xlane.xlu0 %1706 }
 0xac2   : > { %3148 = vrcp.f32 %v1707_v15 }
 0xac3   : > { %v1710_v16 = vpop.xlane.xlu1 %1709 }
 0xac4   : > { %3150 = vrcp.f32 %v1710_v16  ;;  %v2751_v16 = vld [vmem:[%s3363_s24 + $0xc] sm:$0xf] }
 0xacc   : > { %v3149_v17 = vpop.eup %3148 }
 0xacd   : > { %v1713_v20 = vmul.f32 %v3149_v17, %v3145_v2  ;;  %v2120_v17 = vsel %vm1020_vm10, %v2751_v16, 0 }
 0xace   : > { %v3151_v18 = vpop.eup %3150 }
 0xacf   : > { %v1714_v21 = vmul.f32 %v3151_v18, %v3147_v5 }
 0xad1   : > { %v1715_v24 = vpack.c.bf16 %v1714_v21, %v1713_v20 }
 0xad3   : > { %2971 = vmatmul.mubr.msk.bf16.vlgmr.msra.gmra.mrb[32].mxu0 %vm992_vm8, %v1715_v24 }
 0xad4   : > { %2984 = vmatprep.mubr.msk.bf16.mxu0 %vm3213_vm5, %v3212_v19  ;;  %2981 = vmatpush3.bf16.msra.mxu0 %v3118_v26 }
 0xad5   : > { %2982 = vmatprep.subr.bf16.mxu0 %v3212_v19 }
 0xad8   : > { %2983 = vmatpush3.bf16.msra.mxu0 %v3119_v27 }
 0xad9   : > { %2996 = vmatprep.subr.bf16.mxu0 %v3212_v19 }
 0xadb   : > { %2985 = vmatmul.mubr.msk.bf16.vlgmr.msra.gmra.mrb[36].mxu0 %vm772_vm6, %v3416_v25 }
 0xadc   : > { %3000 = vmatprep.mubr.msk.bf16.mxu0 %vm3213_vm5, %v3212_v19 }
 0xba6   : > { %v1756_v28 = vpop.f32.mrb[32].mxu0 }
 0xba7   : > { %v2972_v29 = vpop.f32.mrb[33].mxu0 }
 0xba8   : > { %v1759_v30 = vpop.f32.mrb[34].mxu0 }
 0xba9   : > { %v1763_v32 = vpack.c.bf16 %v1759_v30, %v1756_v28  ;;  %v2973_v33 = vpop.f32.mrb[35].mxu0 }
 0xbab   : > { %2977 = vmatmul.mubr.msk.bf16.vlgmr.msra.gmra.mrb[32].mxu1 %vm934_vm7, %v1763_v32 }
 0xbac   : > { %2989 = vmatpush3.bf16.msra.mxu1 %v3116_v31  ;;  %2992 = vmatprep.mubr.msk.bf16.mxu1 %vm3213_vm5, %v3212_v19 }
 0xbad   : > { %2990 = vmatprep.subr.bf16.mxu1 %v3212_v19 }
 0xbae   : > { %v1866_v35 = vpop.f32.mrb[36].mxu0 }
 0xbaf   : > { %v2986_v36 = vpop.f32.mrb[37].mxu0 }
 0xbb0   : > { %2991 = vmatpush3.bf16.msra.mxu1 %v3117_v34  ;;  %v1869_v38 = vpop.f32.mrb[38].mxu0 }
 0xbb1   : > { %3004 = vmatprep.subr.bf16.mxu1 %v3212_v19  ;;  %v1989_v39 = vpack.c.bf16 %v1869_v38, %v1866_v35  ;;  %v2987_v42 = vpop.f32.mrb[39].mxu0 }
 0xbb3   : > { %2993 = vmatmul.mubr.msk.bf16.vlgmr.msra.gmra.mrb[36].mxu1 %vm772_vm6, %v3416_v25 }
 0xbb4   : > { %3006 = vmatprep.mubr.msk.bf16.mxu1 %vm3213_vm5, %v3212_v19 }
 0xc7e   : > { %v1806_v43 = vpop.f32.mrb[32].mxu1 }
 0xc7f   : > { %v3591_v44 = vadd.f32 %v1806_v43, %v3542_v37  ;;  %v2978_v45 = vpop.f32.mrb[33].mxu1  ;;  %v3120_v37 = vld [vmem:[%s3358_s26 + $0x30] sm:$0xff]  }
 0xc80   : > { %v1809_v46 = vpop.f32.mrb[34].mxu1  ;;  %2997 = vmatpush3.bf16.msra.mxu0 %v3120_v37  ;;  %v3123_v37 = vld [vmem:[%s3368_s13 + $0x8] sm:$0xff]  }
 0xc81   : > { %v3594_v47 = vadd.f32 %v1809_v46, %v3544_v41  ;;  %v2979_v48 = vpop.f32.mrb[35].mxu1  ;;  %v3121_v41 = vld [vmem:[%s3358_s26 + $0x38] sm:$0xff]   ;;  %2998 = vmatprep.subr.bf16.mxu0 %v3212_v19 }
 0xc84   : > { %2999 = vmatpush3.bf16.msra.mxu0 %v3121_v41  ;;  %v3124_v41 = vld [vmem:[%s3373_s4] sm:$0xff]  }
 0xc85   : > { %3010 = vmatprep.subr.bf16.mxu0 %v3212_v19 }
 0xc86   : > { %v1924_v49 = vpop.f32.mrb[36].mxu1 }
 0xc87   : > { %v2994_v50 = vpop.f32.mrb[37].mxu1  ;;  %3001 = vmatmul.mubr.msk.bf16.vlgmr.msra.gmra.mrb[40].mxu0 %vm772_vm6, %v3416_v25 }
 0xc88   : > { %v1927_v51 = vpop.f32.mrb[38].mxu1  ;;  %3012 = vmatprep.mubr.msk.bf16.mxu0 %vm3213_vm5, %v3212_v19 }
 0xc89   : > { %v1990_v52 = vpack.c.bf16 %v1927_v51, %v1924_v49  ;;  %v2995_v53 = vpop.f32.mrb[39].mxu1 }
 0xc8b   : > { %v1996_v54 = vsel %vm934_vm7, %v1990_v52, 0 }
 0xc8c   : > { %3005 = vmatpush3.bf16.xpose.msra.mxu1 %v1996_v54  ;;  %v3122_v54 = vld [vmem:[%s3368_s13] sm:$0xff]  }
 0xc8d   : > { %3016 = vmatprep.subr.bf16.mxu1 %v3212_v19 }
 0xc93   : > { %3007 = vmatmul.mubr.msk.bf16.vlgmr.msra.gmra.mrb[40].mxu1 %vm934_vm7, %v1989_v39 }
 0xc94   : > { %3018 = vmatprep.mubr.msk.bf16.mxu1 %vm3213_vm5, %v3212_v19  ;;  %3017 = vmatpush3.bf16.msra.mxu1 %v2120_v17 }
 0xc95   : > { %3030 = vmatprep.subr.bf16.mxu1 %v3212_v19 }
 0xd5a   : > { %v1982_v10 = vpop.f32.mrb[40].mxu0 }
 0xd5b   : > { %v3002_v11 = vpop.f32.mrb[41].mxu0 }
 0xd5c   : > { %v1985_v12 = vpop.f32.mrb[42].mxu0 }
 0xd5d   : > { %v3003_v13 = vpop.f32.mrb[43].mxu0  ;;  %v1991_v14 = vpack.c.bf16 %v1985_v12, %v1982_v10 }
 0xd5e   : > { %v3126_v13 = vld [vmem:[%s3373_s4 + $0x10] sm:$0xff]  }
 0xd5f   : > { %v2070_v15 = vand.u32 %v1991_v14, %v3456_v3  ;;  %v3127_v14 = vld [vmem:[%s3373_s4 + $0x18] sm:$0xff]  }
 0xd61   : > { %3011 = vmatpush3.bf16.msra.mxu0 %v2070_v15 }
 0xd62   : > { %3022 = vmatprep.subr.bf16.mxu0 %v3212_v19 }
 0xd66   : > { %v2032_v55 = vpop.f32.mrb[40].mxu1 }
 0xd67   : > { %v2039_v56 = vmul.f32 0.35355338, %v2032_v55  ;;  %v3008_v57 = vpop.f32.mrb[41].mxu1  ;;  %v3125_v55 = vld [vmem:[%s3373_s4 + $0x8] sm:$0xff]   ;;  %s3742_s4 = sld [smem:[#allocation17_spill]] (!%p2761_p8) }
 0xd68   : > { %v2035_v58 = vpop.f32.mrb[42].mxu1 }
 0xd69   : > { %v2040_v59 = vmul.f32 0.35355338, %v2035_v58  ;;  %v3009_v60 = vpop.f32.mrb[43].mxu1  ;;  %v2041_v61 = vadd.f32 %v3447_v40, %v2039_v56  ;;  %v2195_v58 = vlaneseq }
 0xd6b   : > { %v2043_v62 = vsel %vm992_vm8, %v2041_v61, -inf  ;;  %v2042_v63 = vadd.f32 %v3447_v40, %v2040_v59 }
 0xd6c   : > { %2044 = vmax.xlane.f32.xlu0 %v2043_v62 }
 0xd6d   : > { %v2046_v0 = vsel %vm996_vm9, %v2042_v63, -inf }
 0xd6e   : > { %2047 = vmax.xlane.f32.xlu1 %v2046_v0 }
 0xdf9   : > { %v2045_v25 = vpop.xlane.xlu0 %2044 }
 0xdfa   : > { %v2049_v1 = vsub.f32 %v2041_v61, %v2045_v25  ;;  %v3645_v25 = vld [vmem:[%s3378_s28] sm:$0xff] }
 0xdfb   : > { %v2048_v2 = vpop.xlane.xlu1 %2047 }
 0xdfc   : > { %v2051_v4 = vmul.f32 1.442695, %v2049_v1  ;;  %v2050_v5 = vsub.f32 %v2042_v63, %v2048_v2  ;;  %v3641_v63 = vshrl.u32 %v2195_v58, 7 }
 0xdfe   : > { %3152 = vpow2.f32 %v2051_v4  ;;  %v2053_v6 = vmul.f32 1.442695, %v2050_v5  ;;  %v2197_v0 = vsub.s32 0, %v3641_v63  ;;  %v2203_v2 = vsub.s32 1, %v3641_v63 }
 0xdff   : > { %v2214_v15 = vsub.s32 2, %v3641_v63 }
 0xe00   : > { %3154 = vpow2.f32 %v2053_v6  ;;  %v2198_v1 = vrot.slane %v3645_v25, %v2197_v0 }
 0xe01   : > { %v2215_v16 = vrot.slane %v3645_v25, %v2214_v15 }
 0xe08   : > { %v3153_v7 = vpop.eup %3152 }
 0xe09   : > { %v2055_v8 = vsel %vm992_vm8, %v3153_v7, 0.0 }
 0xe0a   : > { %v3155_v9 = vpop.eup %3154  ;;  %2056 = vadd.xlane.f32.xlu0 %v2055_v8 }
 0xe0b   : > { %v2058_v40 = vsel %vm996_vm9, %v3155_v9, 0.0 }
 0xe0c   : > { %2059 = vadd.xlane.f32.xlu1 %v2058_v40 }
 0xe97   : > { %v2057_v18 = vpop.xlane.xlu0 %2056 }
 0xe98   : > { %3156 = vrcp.f32 %v2057_v18 }
 0xe99   : > { %v2060_v20 = vpop.xlane.xlu1 %2059 }
 0xe9a   : > { %3158 = vrcp.f32 %v2060_v20 }
 0xea2   : > { %v3157_v21 = vpop.eup %3156 }
 0xea3   : > { %v2063_v26 = vmul.f32 %v3157_v21, %v3153_v7 }
 0xea4   : > { %v3159_v24 = vpop.eup %3158 }
 0xea5   : > { %v2064_v27 = vmul.f32 %v3159_v24, %v3155_v9  ;;  %v2204_v9 = vrot.slane %v3645_v25, %v2203_v2 }
 0xea7   : > { %v2065_v28 = vpack.c.bf16 %v2064_v27, %v2063_v26 }
 0xea9   : > { %3013 = vmatmul.mubr.msk.bf16.vlgmr.msra.gmra.mrb[44].mxu0 %vm992_vm8, %v2065_v28 }
 0xeaa   : > { %3026 = vmatprep.mubr.msk.bf16.mxu0 %vm3213_vm5, %v3212_v19  ;;  %3023 = vmatpush3.bf16.msra.mxu0 %v3122_v54 }
 0xeab   : > { %3024 = vmatprep.subr.bf16.mxu0 %v3212_v19 }
 0xeae   : > { %3025 = vmatpush3.bf16.msra.mxu0 %v3123_v37 }
 0xf7c   : > { %v2106_v3 = vpop.f32.mrb[44].mxu0 }
 0xf7d   : > { %v3014_v29 = vpop.f32.mrb[45].mxu0 }
 0xf7e   : > { %v2109_v30 = vpop.f32.mrb[46].mxu0  ;;  %v2285_v29 = vsub.s32 3, %v3641_v63 }
 0xf7f   : > { %v2113_v31 = vpack.c.bf16 %v2109_v30, %v2106_v3  ;;  %v3015_v32 = vpop.f32.mrb[47].mxu0 }
 0xf81   : > { %3019 = vmatmul.mubr.msk.bf16.vlgmr.msra.gmra.mrb[44].mxu1 %vm934_vm7, %v2113_v31 }
 0xf82   : > { %3038 = vmatprep.mubr.msk.bf16.mxu1 %vm3213_vm5, %v3212_v19  ;;  %3031 = vmatpush3.bf16.msra.mxu1 %v3124_v41 }
 0xf83   : > { %3032 = vmatprep.subr.bf16.mxu1 %v3212_v19 }
 0xf86   : > { %3033 = vmatpush3.bf16.msra.mxu1 %v3125_v55  ;;  %v2386_v55 = vsub.s32 4, %v3641_v63 }
 0xf87   : > { %3034 = vmatprep.subr.bf16.mxu1 %v3212_v19 }
 0xf8a   : > { %3035 = vmatpush3.bf16.msra.mxu1 %v3126_v13 }
 0xf8b   : > { %3036 = vmatprep.subr.bf16.mxu1 %v3212_v19  ;;  %v2286_v19 = vrot.slane %v3645_v25, %v2285_v29 }
 0xf8e   : > { %3037 = vmatpush3.bf16.msra.mxu1 %v3127_v14 }
0x1054   : > { %v2156_v33 = vpop.f32.mrb[44].mxu1 }
0x1055   : > { %v2163_v34 = vadd.f32 %v2156_v33, %v3591_v44  ;;  %v3020_v35 = vpop.f32.mrb[45].mxu1 }
0x1056   : > { %v2159_v36 = vpop.f32.mrb[46].mxu1 }
0x1057   : > { %v2164_v38 = vadd.f32 %v2159_v36, %v3594_v47  ;;  %v3021_v39 = vpop.f32.mrb[47].mxu1  ;;  %v2165_v42 = vadd.f32 %v2163_v34, %v3407_v22 }
0x1059   : > { %v2167_v43 = vsel %vm772_vm6, %v2165_v42, 0.0  ;;  %v2166_v45 = vadd.f32 %v2164_v38, %v3409_v23 }
0x105a   : > { %2168 = vadd.xlane.f32.xlu0 %v2167_v43 }
0x105b   : > { %v2171_v46 = vsel %vm2170_vm12, %v2166_v45, 0.0 }
0x105c   : > { %2172 = vadd.xlane.f32.xlu1 %v2171_v46 }
0x10e7   : > { %v2169_v48 = vpop.xlane.xlu0 %2168 }
0x10e8   : > { %v2175_v44 = vmul.f32 0.03125, %v2169_v48 }
0x10e9   : > { %v2173_v49 = vpop.xlane.xlu1 %2172 }
0x10ea   : > { %v2177_v50 = vsub.f32 %v2165_v42, %v2175_v44  ;;  %v2176_v47 = vmul.f32 0.03125, %v2173_v49 }
0x10ec   : > { %v2178_v51 = vsub.f32 %v2166_v45, %v2176_v47  ;;  %v2179_v22 = vmul.f32 %v2177_v50, %v2177_v50 }
0x10ee   : > { %v2181_v52 = vsel %vm772_vm6, %v2179_v22, 0.0  ;;  %v2180_v53 = vmul.f32 %v2178_v51, %v2178_v51 }
0x10ef   : > { %2182 = vadd.xlane.f32.xlu0 %v2181_v52 }
0x10f0   : > { %v2184_v23 = vsel %vm2170_vm12, %v2180_v53, 0.0 }
0x10f1   : > { %2185 = vadd.xlane.f32.xlu1 %v2184_v23 }
0x117c   : > { %v2183_v56 = vpop.xlane.xlu0 %2182 }
0x117d   : > { %v2187_v57 = vmul.f32 0.03125, %v2183_v56  ;;  %v2392_v56 = vsub.s32 5, %v3641_v63  ;;  %v3168_v63 = vld [vmem:[%s3741_s27] sm:$0xff] (!%p2761_p8)  }
0x117e   : > { %v2186_v59 = vpop.xlane.xlu1 %2185 }
0x117f   : > { %v2189_v60 = vadd.f32 1e-06, %v2187_v57  ;;  %v2188_v61 = vmul.f32 0.03125, %v2186_v59  ;;  %v2387_v57 = vrot.slane %v3645_v25, %v2386_v55  ;;  %v2393_v59 = vrot.slane %v3645_v25, %v2392_v56 }
0x1180   : > { %v3215_v25 = vmov (!%p2761_p8), 0.0  }
0x1181   : > { %3160 = vrsqrt.f32 %v2189_v60  ;;  %v2190_v62 = vadd.f32 1e-06, %v2188_v61  ;;  %3042 = vmatprep.subr.bf16.mxu0 (!%p2761_p8), %v3215_v25 }
0x1183   : > { %3162 = vrsqrt.f32 %v2190_v62 }
0x118b   : > { %v3161_v4 = vpop.eup %3160 }
0x118c   : > { %v2193_v5 = vmul.f32 %v3161_v4, %v2177_v50 }
0x118d   : > { %v3163_v6 = vpop.eup %3162 }
0x118e   : > { %v2199_v7 = vmul.f32 %v2198_v1, %v2193_v5  ;;  %v2194_v8 = vmul.f32 %v3163_v6, %v2178_v51  ;;  %v3169_v5 = vld [vmem:[%s3741_s27 + $0x8] sm:$0xff] (!%p2761_p8)  }
0x1190   : > { %v2200_v40 = vmul.f32 %v2198_v1, %v2194_v8  ;;  %v2205_v10 = vadd.f32 %v2204_v9, %v2199_v7  ;;  %v2762_v7 = vld [vmem:[%s3742_s4] ss:$0 sm:$0xff] (!%p2761_p8) }
0x1192   : > { %v2206_v11 = vadd.f32 %v2204_v9, %v2200_v40 }
0x1194   : > { %v2207_v12 = vpack.c.bf16 %v2206_v11, %v2205_v10 }
0x1196   : > { %3027 = vmatmul.mubr.msk.bf16.vlgmr.msra.gmra.mrb[48].mxu0 %vm772_vm6, %v2207_v12 }
0x1197   : > { %3043 = vmatpush3.bf16.msra.mxu0 (!%p2761_p8), %v3168_v63  ;;  %3046 = vmatprep.mubr.msk.bf16.mxu0 (!%p2761_p8), %vm3216_vm14, %v3215_v25 }
0x1198   : > { %3044 = vmatprep.subr.bf16.mxu0 (!%p2761_p8), %v3215_v25 }
0x119b   : > { %3045 = vmatpush3.bf16.msra.mxu0 (!%p2761_p8), %v3169_v5 }
0x1269   : > { %v2265_v17 = vpop.f32.mrb[48].mxu0 }
0x126a   : > { %v2266_v18 = vadd.f32 %v2265_v17, %v2215_v16  ;;  %v3028_v20 = vpop.f32.mrb[49].mxu0 }
0x126b   : > { %v2268_v21 = vpop.f32.mrb[50].mxu0 }
0x126c   : > { %v2269_v24 = vadd.f32 %v2268_v21, %v2215_v16  ;;  %v3029_v26 = vpop.f32.mrb[51].mxu0  ;;  %v2272_v27 = vmax.f32 %v2266_v18, 0.0 }
0x126e   : > { %v2273_v28 = vmax.f32 %v2269_v24, 0.0 }
0x1270   : > { %v2274_v3 = vpack.c.bf16 %v2273_v28, %v2272_v27 }
0x1272   : > { %3039 = vmatmul.mubr.msk.bf16.vlgmr.msra.gmra.mrb[48].mxu1 %vm2311_vm13, %v2274_v3 }
0x1345   : > { %v2349_v30 = vpop.f32.mrb[48].mxu1 }
0x1346   : > { %v2350_v31 = vadd.f32 %v2349_v30, %v2286_v19  ;;  %v3040_v32 = vpop.f32.mrb[49].mxu1 }
0x1347   : > { %v2352_v33 = vpop.f32.mrb[50].mxu1 }
0x1348   : > { %v2353_v34 = vadd.f32 %v2352_v33, %v2286_v19  ;;  %v3041_v35 = vpop.f32.mrb[51].mxu1  ;;  %v2356_v36 = vadd.f32 %v2350_v31, %v2205_v10 }
0x134a   : > { %v2358_v38 = vsel %vm772_vm6, %v2356_v36, 0.0  ;;  %v2357_v39 = vadd.f32 %v2353_v34, %v2206_v11 }
0x134b   : > { %2359 = vadd.xlane.f32.xlu0 %v2358_v38 }
0x134c   : > { %v2361_v42 = vsel %vm2170_vm12, %v2357_v39, 0.0 }
0x134d   : > { %2362 = vadd.xlane.f32.xlu1 %v2361_v42 }
0x13d8   : > { %v2360_v43 = vpop.xlane.xlu0 %2359 }
0x13d9   : > { %v2364_v45 = vmul.f32 0.03125, %v2360_v43 }
0x13da   : > { %v2363_v46 = vpop.xlane.xlu1 %2362 }
0x13db   : > { %v2366_v48 = vsub.f32 %v2356_v36, %v2364_v45  ;;  %v2365_v44 = vmul.f32 0.03125, %v2363_v46 }
0x13dd   : > { %v2367_v49 = vsub.f32 %v2357_v39, %v2365_v44  ;;  %v2368_v50 = vmul.f32 %v2366_v48, %v2366_v48 }
0x13df   : > { %v2370_v47 = vsel %vm772_vm6, %v2368_v50, 0.0  ;;  %v2369_v51 = vmul.f32 %v2367_v49, %v2367_v49 }
0x13e0   : > { %2371 = vadd.xlane.f32.xlu0 %v2370_v47 }
0x13e1   : > { %v2373_v22 = vsel %vm2170_vm12, %v2369_v51, 0.0 }
0x13e2   : > { %2374 = vadd.xlane.f32.xlu1 %v2373_v22 }
0x146d   : > { %v2372_v52 = vpop.xlane.xlu0 %2371 }
0x146e   : > { %v2376_v53 = vmul.f32 0.03125, %v2372_v52 }
0x146f   : > { %v2375_v23 = vpop.xlane.xlu1 %2374 }
0x1470   : > { %v2378_v54 = vadd.f32 1e-06, %v2376_v53  ;;  %v2377_v37 = vmul.f32 0.03125, %v2375_v23 }
0x1472   : > { %3164 = vrsqrt.f32 %v2378_v54  ;;  %v2379_v41 = vadd.f32 1e-06, %v2377_v37 }
0x1474   : > { %3166 = vrsqrt.f32 %v2379_v41 }
0x147c   : > { %v3165_v58 = vpop.eup %3164 }
0x147d   : > { %v2382_v60 = vmul.f32 %v3165_v58, %v2366_v48 }
0x147e   : > { %v3167_v61 = vpop.eup %3166 }
0x147f   : > { %v2388_v62 = vmul.f32 %v2387_v57, %v2382_v60  ;;  %v2383_v0 = vmul.f32 %v3167_v61, %v2367_v49  ;;  %2401 = sbr.rel (%p2761_p8) target bundleno = 5472 (0x1560), region = 88 }
0x1481   : > { %v2394_v1 = vadd.f32 %v2393_v59, %v2388_v62  ;;  %v2389_v2 = vmul.f32 %v2387_v57, %v2383_v0 }
0x1483   : > { %2396 = vst.msk [vmem:[#allocation2] sm:$0xff] %vm772_vm6, %v2394_v1  ;;  %v2395_v4 = vadd.f32 %v2393_v59, %v2389_v2 }
0x1485   : > { %2397 = vst.msk [vmem:[#allocation2 + $0x8] sm:$0x1] %vm2170_vm12, %v2395_v4  ;;  %v2402_v6 = vpack.c.bf16 (!%p2761_p8), %v2395_v4, %v2394_v1 }
0x1487   : > { %3047 = vmatmul.mubr.msk.bf16.vlgmr.msra.gmra.mrb[0].mxu0 %vm772_vm6, %v2402_v6 }
0x155a   : > { %v2463_v8 = vpop.f32.mrb[0].mxu0 }
0x155b   : > { %v2464_v9 = vadd.f32 %v2762_v7, %v2463_v8  ;;  %v3048_v40 = vpop.f32.mrb[1].mxu0 }
0x155c   : > { %v2466_v10 = vpop.f32.mrb[2].mxu0 }
0x155d   : > { %2470 = vst [vmem:[%s3384_s8] sm:$0xff] %v2464_v9  ;;  %v2467_v11 = vadd.f32 %v2762_v7, %v2466_v10  ;;  %v3049_v12 = vpop.f32.mrb[3].mxu0 }
0x155f   : > { %2471 = vst [vmem:[%s3384_s8 + $0x8] sm:$0x1] %v2467_v11 }
0x1560 PF: > { %s3743_s28 = sld [smem:[#allocation5_spill]]  ;;  %s3744_s18 = sld [smem:[#allocation3_spill]] }
0x1561   : > { %s3745_s19 = sld [smem:[#allocation4_spill]]  ;;  %s3746_s20 = sld [smem:[#allocation6_spill]] }
0x1562   : > { %s3747_s21 = sld [smem:[#allocation7_spill]] }
0x1566   : > { %s25_s22 = sadd.s32 1, %s3743_s28  }
0x1567   : > { %p22_p9 = scmp.ge.s32.totalorder %s25_s22, 6  }
0x1569   :  { %24 = sbr.rel (!%p22_p9) target bundleno = 11 (0xb), region = 157 }

</bundles_post_ra>
